<compile_context>
chip_gen: v5e
topology: v5e:2x2
jax: 0.10.0
libtpu: 0.0.40
codegen_flags: <defaults>
</compile_context>

<pallas_src>
import math
import numpy as np
import jax
import jax.numpy as jnp
from jax.experimental import pallas as pl
from jax.experimental.pallas import tpu as pltpu

# ----------------------------- configuration ---------------------------------
CHANNELS_P3 = 32
CHANNELS_P4 = 64
CHANNELS_P5 = 128
REG_MAX_DEFAULT = 4
EMBEDDING_DIM_DEFAULT = 16
NO = 4 * REG_MAX_DEFAULT + 1 + EMBEDDING_DIM_DEFAULT   # 33 outputs per cell
BN_EPS = 1e-3                                          # Ultralytics Conv BN eps
LANE = 128                                             # TPU lane width


# ------------------------------ Pallas kernel --------------------------------
def head_kernel(x_ref, w1_ref, b1_ref, w2_ref, b2_ref, w3_ref, b3_ref, o_ref):
    """Fused SingleScaleDetectionHead forward for one image (one grid step).

    x_ref  : (1, H, W, Cin)   bf16, UNPADDED input (halo pad done in VMEM here)
    w1_ref : (9, Cin, Cm)     bf16, conv1 weights (BN scale folded), tap-major
    b1_ref : (1, Cm)          f32,  folded BN bias
    w2_ref : (9, Cm, Cm)      bf16
    b2_ref : (1, Cm)          f32
    w3_ref : (Cm, Np)         bf16, 1x1 prediction conv (outputs padded to 128)
    b3_ref : (1, Np)          f32,  prediction bias (objectness channel preset)
    o_ref  : (1, H, W, Np)    f32,  lane-dense output slab
    """
    _, H, W, _ = o_ref.shape
    Np = o_ref.shape[-1]
    Cm = w1_ref.shape[-1]
    M = H * W

    def silu_f32(y):                     # f32 bias+activation on the VPU/EUP
        return y * jax.nn.sigmoid(y)

    def conv3x3_accum(xpad, w_ref, b_ref):
        # xpad: (H+2, W+2, C) bf16.  9 shift-and-accumulate MXU matmuls,
        # f32 accumulation; no im2col strip is ever materialized.
        acc = None
        for t in range(9):
            dy, dx = divmod(t, 3)
            tap = xpad[dy:dy + H, dx:dx + W, :].reshape(M, xpad.shape[-1])
            part = jnp.dot(tap, w_ref[t], preferred_element_type=jnp.float32)
            acc = part if acc is None else acc + part
        return acc + b_ref[...]

    # conv1 (+ folded BN) + SiLU : in-kernel halo pad of the bf16 input
    xpad = jnp.pad(x_ref[0], ((1, 1), (1, 1), (0, 0)))
    h1 = silu_f32(conv3x3_accum(xpad, w1_ref, b1_ref)).astype(jnp.bfloat16)

    # conv2 (+ folded BN) + SiLU : halo pad of the bf16 intermediate
    h1p = jnp.pad(h1.reshape(H, W, Cm), ((1, 1), (1, 1), (0, 0)))
    h2 = silu_f32(conv3x3_accum(h1p, w2_ref, b2_ref)).astype(jnp.bfloat16)

    # 1x1 prediction conv + bias : lane-dense (Np = 128) store
    pred = jnp.dot(h2, w3_ref[...], preferred_element_type=jnp.float32) + b3_ref[...]
    o_ref[...] = pred.reshape(1, H, W, Np)


def run_single_scale_head(x_nhwc, params):
    """pallas_call wrapper for one head. x_nhwc: (B, H, W, Cin) f32 NHWC."""
    B, H, W, Cin = x_nhwc.shape
    Cm = params["w1"].shape[-1]
    Np = params["w3"].shape[-1]
    no = params["no"]

    # DMA the input as bf16 (halves input HBM traffic); no wrapper-side pad.
    x_bf16 = x_nhwc.astype(jnp.bfloat16)

    M = H * W
    flops = B * (2 * M * 9 * Cin * Cm + 2 * M * 9 * Cm * Cm + 2 * M * Cm * Np)
    bytes_accessed = int(
        x_bf16.size * 2
        + sum(int(params[k].size) * params[k].dtype.itemsize
              for k in ("w1", "b1", "w2", "b2", "w3", "b3"))
        + B * M * Np * 4)
    cost = pl.CostEstimate(flops=flops, transcendentals=2 * B * M * Cm,
                           bytes_accessed=bytes_accessed)

    out = pl.pallas_call(
        head_kernel,
        out_shape=jax.ShapeDtypeStruct((B, H, W, Np), jnp.float32),
        grid=(B,),   # one image per step: v7x megacore split + DMA pipelining
        in_specs=[
            pl.BlockSpec((1, H, W, Cin), lambda b: (b, 0, 0, 0)),
            pl.BlockSpec(params["w1"].shape, lambda b: (0, 0, 0)),
            pl.BlockSpec(params["b1"].shape, lambda b: (0, 0)),
            pl.BlockSpec(params["w2"].shape, lambda b: (0, 0, 0)),
            pl.BlockSpec(params["b2"].shape, lambda b: (0, 0)),
            pl.BlockSpec(params["w3"].shape, lambda b: (0, 0)),
            pl.BlockSpec(params["b3"].shape, lambda b: (0, 0)),
        ],
        out_specs=pl.BlockSpec((1, H, W, Np), lambda b: (b, 0, 0, 0)),
        compiler_params=pltpu.CompilerParams(
            dimension_semantics=("parallel",),      # images are independent
            vmem_limit_bytes=32 * 1024 * 1024),     # > v5e's 16 MiB default,
                                                    # < v7x's 64 MiB physical
        cost_estimate=cost,
    )(x_bf16, params["w1"], params["b1"], params["w2"], params["b2"],
      params["w3"], params["b3"])

    # TODO(synk): if the consumer accepts NHWC / the 128-wide slab, drop this
    # slice (+ the NCHW transpose below) to save an extra strided HBM pass.
    return out[..., :no]


def single_scale_detection_head_forward(x_nchw, kern_params):
    """Module-facing forward: NCHW in, NCHW out (like the PyTorch module)."""
    x_nhwc = jnp.transpose(x_nchw, (0, 2, 3, 1))            # NCHW -> NHWC
    out_nhwc = run_single_scale_head(x_nhwc, kern_params)   # Pallas kernel
    return jnp.transpose(out_nhwc, (0, 3, 1, 2))            # NHWC -> NCHW


# ------------------------- parameter construction ----------------------------
def make_head_params(key, in_channels, reg_max, embedding_dim):
    """Synthetic parameters for one SingleScaleDetectionHead_Prompt.

    Returns (kernel_params, ref_params):
      kernel_params : BN folded into weights, tap-major (9, Cin, Cout) bf16
                      layout; only the 1x1-conv output dim is lane-padded.
      ref_params    : original HWIO weights + separate BN scale/bias (f32),
                      used only by the pure-JAX reference.
    """
    no = 4 * reg_max + 1 + embedding_dim
    cm = max(in_channels // 2, no // 4, 64)            # intermediate_channels
    npad = ((no + LANE - 1) // LANE) * LANE            # lane-padded outputs

    k1, k2, k3 = jax.random.split(key, 3)
    w1 = 0.05 * jax.random.normal(k1, (3, 3, in_channels, cm), jnp.float32)
    w2 = 0.05 * jax.random.normal(k2, (3, 3, cm, cm), jnp.float32)
    w3 = 0.05 * jax.random.normal(k3, (cm, no), jnp.float32)

    # Freshly-initialised BatchNorm (gamma=1, beta=0, mean=0, var=1), eval mode.
    def bn_fold(c):
        gamma = jnp.ones((c,), jnp.float32)
        beta = jnp.zeros((c,), jnp.float32)
        mean = jnp.zeros((c,), jnp.float32)
        var = jnp.ones((c,), jnp.float32)
        scale = gamma / jnp.sqrt(var + BN_EPS)
        return scale, beta - mean * scale

    s1, bb1 = bn_fold(cm)
    s2, bb2 = bn_fold(cm)

    # Prediction bias: zeros except objectness channel = -log((1-0.01)/0.01).
    obj_idx = 4 * reg_max
    b3 = jnp.zeros((no,), jnp.float32).at[obj_idx].set(
        np.float32(-math.log((1.0 - 0.01) / 0.01)))

    # ---- kernel-side parameters (BN folded, tap-major layout, bf16) ---------
    w1k = (w1 * s1).reshape(9, in_channels, cm).astype(jnp.bfloat16)
    b1k = bb1.reshape(1, cm)
    w2k = (w2 * s2).reshape(9, cm, cm).astype(jnp.bfloat16)
    b2k = bb2.reshape(1, cm)
    w3k = jnp.zeros((cm, npad), jnp.float32).at[:, :no].set(w3).astype(jnp.bfloat16)
    b3k = jnp.zeros((1, npad), jnp.float32).at[0, :no].set(b3)

    kern = dict(w1=w1k, b1=b1k, w2=w2k, b2=b2k, w3=w3k, b3=b3k, no=no)
    ref = dict(w1=w1, s1=s1, b1=bb1, w2=w2, s2=s2, b2=bb2, w3=w3, b3=b3)
    return kern, ref


# --------------------------- pure-JAX reference -------------------------------
def head_reference(x_nhwc, p):
    def conv3x3_bn_silu(x, w, s, b):
        y = jax.lax.conv_general_dilated(
            x, w, (1, 1), "SAME",
            dimension_numbers=("NHWC", "HWIO", "NHWC"),
            precision=jax.lax.Precision.HIGHEST)
        y = y * s.reshape(1, 1, 1, -1) + b.reshape(1, 1, 1, -1)
        return y * jax.nn.sigmoid(y)

    h = conv3x3_bn_silu(x_nhwc, p["w1"], p["s1"], p["b1"])
    h = conv3x3_bn_silu(h, p["w2"], p["s2"], p["b2"])
    return (jnp.einsum("bhwc,cn->bhwn", h, p["w3"],
                       precision=jax.lax.Precision.HIGHEST)
            + p["b3"].reshape(1, 1, 1, -1))


# ----------------------------------- main -------------------------------------
if __name__ == "__main__":
    key = jax.random.PRNGKey(0)
    kx, kp = jax.random.split(key)

    IMG = 64   # PoC image size -> P3 8x8, P4 4x4, P5 2x2 feature maps
    scales = [(CHANNELS_P3, 8), (CHANNELS_P4, 16), (CHANNELS_P5, 32)]

    for i, (cin, stride) in enumerate(scales):
        hf = IMG // stride
        feat = jax.random.normal(jax.random.fold_in(kx, i),
                                 (2, cin, hf, hf), jnp.float32)   # NCHW feature
        kern_p, ref_p = make_head_params(jax.random.fold_in(kp, i), cin,
                                         REG_MAX_DEFAULT, EMBEDDING_DIM_DEFAULT)

        pred = single_scale_detection_head_forward(feat, kern_p)   # Pallas path
        pred = jax.block_until_ready(pred)
        assert pred.shape == (2, NO, hf, hf), pred.shape

        # correctness vs. a pure-JAX f32 reference (kernel uses bf16 MXU inputs
        # with f32 accumulation -> compare at bf16-appropriate tolerance)
        ref = head_reference(jnp.transpose(feat, (0, 2, 3, 1)), ref_p)
        ref = jnp.transpose(ref, (0, 3, 1, 2))
        np.testing.assert_allclose(np.asarray(pred), np.asarray(ref),
                                   rtol=2e-2, atol=2e-2)

    print("KERNEL_OK")
</pallas_src>

<mosaic_0001>
module attributes {stable_mosaic.version = 11 : i64} {
  func.func @head_kernel(%arg0: i32, %arg1: memref<1x8x8x32xbf16, #tpu.memory_space<vmem>>, %arg2: memref<9x32x64xbf16, #tpu.memory_space<vmem>>, %arg3: memref<1x64xf32, #tpu.memory_space<vmem>>, %arg4: memref<9x64x64xbf16, #tpu.memory_space<vmem>>, %arg5: memref<1x64xf32, #tpu.memory_space<vmem>>, %arg6: memref<64x128xbf16, #tpu.memory_space<vmem>>, %arg7: memref<1x128xf32, #tpu.memory_space<vmem>>, %arg8: memref<1x8x8x128xf32, #tpu.memory_space<vmem>>) attributes {dimension_semantics = [#tpu.dimension_semantics<parallel>], iteration_bounds = array<i64: 2>, scalar_prefetch = 0 : i64, scratch_operands = 0 : i64, tpu.core_type = #tpu.core_type<tc>, window_params = [{transform_indices = @transform_0, window_bounds = array<i64: 1, 8, 8, 32>}, {pipeline_mode = #tpu.pipeline_mode<synchronous>, transform_indices = @transform_1, window_bounds = array<i64: 9, 32, 64>}, {pipeline_mode = #tpu.pipeline_mode<synchronous>, transform_indices = @transform_2, window_bounds = array<i64: 1, 64>}, {pipeline_mode = #tpu.pipeline_mode<synchronous>, transform_indices = @transform_3, window_bounds = array<i64: 9, 64, 64>}, {pipeline_mode = #tpu.pipeline_mode<synchronous>, transform_indices = @transform_4, window_bounds = array<i64: 1, 64>}, {pipeline_mode = #tpu.pipeline_mode<synchronous>, transform_indices = @transform_5, window_bounds = array<i64: 64, 128>}, {pipeline_mode = #tpu.pipeline_mode<synchronous>, transform_indices = @transform_6, window_bounds = array<i64: 1, 128>}, {transform_indices = @transform_7, window_bounds = array<i64: 1, 8, 8, 128>}]} {
    %c0 = arith.constant 0 : index
    %c0_0 = arith.constant 0 : index
    %c0_1 = arith.constant 0 : index
    %c0_2 = arith.constant 0 : index
    %0 = vector.load %arg1[%c0, %c0_0, %c0_1, %c0_2] : memref<1x8x8x32xbf16, #tpu.memory_space<vmem>>, vector<1x8x8x32xbf16>
    %1 = vector.shape_cast %0 : vector<1x8x8x32xbf16> to vector<8x8x32xbf16>
    %c0_i32 = arith.constant 0 : i32
    %2 = arith.sitofp %c0_i32 : i32 to bf16
    %3 = vector.broadcast %2 : bf16 to vector<1x8x32xbf16>
    %4 = tpu.concatenate %3, %1 in 0 : vector<1x8x32xbf16>, vector<8x8x32xbf16> -> vector<9x8x32xbf16>
    %5 = vector.broadcast %2 : bf16 to vector<1x8x32xbf16>
    %6 = tpu.concatenate %4, %5 in 0 : vector<9x8x32xbf16>, vector<1x8x32xbf16> -> vector<10x8x32xbf16>
    %7 = vector.broadcast %2 : bf16 to vector<10x1x32xbf16>
    %8 = tpu.concatenate %7, %6 in 1 : vector<10x1x32xbf16>, vector<10x8x32xbf16> -> vector<10x9x32xbf16>
    %9 = vector.broadcast %2 : bf16 to vector<10x1x32xbf16>
    %10 = tpu.concatenate %8, %9 in 1 : vector<10x9x32xbf16>, vector<10x1x32xbf16> -> vector<10x10x32xbf16>
    %11 = vector.extract_strided_slice %10 {offsets = [0, 0, 0], sizes = [8, 8, 32], strides = [1, 1, 1]} : vector<10x10x32xbf16> to vector<8x8x32xbf16>
    %12 = vector.shape_cast %11 : vector<8x8x32xbf16> to vector<64x32xbf16>
    %c0_3 = arith.constant 0 : index
    %c0_4 = arith.constant 0 : index
    %c0_5 = arith.constant 0 : index
    %13 = vector.load %arg2[%c0_3, %c0_4, %c0_5] : memref<9x32x64xbf16, #tpu.memory_space<vmem>>, vector<1x32x64xbf16>
    %14 = vector.shape_cast %13 : vector<1x32x64xbf16> to vector<32x64xbf16>
    %cst = arith.constant dense<0.000000e+00> : vector<64x64xf32>
    %15 = tpu.matmul %12, %14, %cst {dimension_numbers = #tpu.dot_dimension_numbers<[1], [0], [0], [1], [0, 0, 1, 1], [], []>} : vector<64x32xbf16>, vector<32x64xbf16>, vector<64x64xf32> -> vector<64x64xf32>
    %16 = vector.extract_strided_slice %10 {offsets = [0, 1, 0], sizes = [8, 8, 32], strides = [1, 1, 1]} : vector<10x10x32xbf16> to vector<8x8x32xbf16>
    %17 = vector.shape_cast %16 : vector<8x8x32xbf16> to vector<64x32xbf16>
    %c1 = arith.constant 1 : index
    %c0_6 = arith.constant 0 : index
    %c0_7 = arith.constant 0 : index
    %18 = vector.load %arg2[%c1, %c0_6, %c0_7] : memref<9x32x64xbf16, #tpu.memory_space<vmem>>, vector<1x32x64xbf16>
    %19 = vector.shape_cast %18 : vector<1x32x64xbf16> to vector<32x64xbf16>
    %cst_8 = arith.constant dense<0.000000e+00> : vector<64x64xf32>
    %20 = tpu.matmul %17, %19, %cst_8 {dimension_numbers = #tpu.dot_dimension_numbers<[1], [0], [0], [1], [0, 0, 1, 1], [], []>} : vector<64x32xbf16>, vector<32x64xbf16>, vector<64x64xf32> -> vector<64x64xf32>
    %21 = arith.addf %15, %20 : vector<64x64xf32>
    %22 = vector.extract_strided_slice %10 {offsets = [0, 2, 0], sizes = [8, 8, 32], strides = [1, 1, 1]} : vector<10x10x32xbf16> to vector<8x8x32xbf16>
    %23 = vector.shape_cast %22 : vector<8x8x32xbf16> to vector<64x32xbf16>
    %c2 = arith.constant 2 : index
    %c0_9 = arith.constant 0 : index
    %c0_10 = arith.constant 0 : index
    %24 = vector.load %arg2[%c2, %c0_9, %c0_10] : memref<9x32x64xbf16, #tpu.memory_space<vmem>>, vector<1x32x64xbf16>
    %25 = vector.shape_cast %24 : vector<1x32x64xbf16> to vector<32x64xbf16>
    %cst_11 = arith.constant dense<0.000000e+00> : vector<64x64xf32>
    %26 = tpu.matmul %23, %25, %cst_11 {dimension_numbers = #tpu.dot_dimension_numbers<[1], [0], [0], [1], [0, 0, 1, 1], [], []>} : vector<64x32xbf16>, vector<32x64xbf16>, vector<64x64xf32> -> vector<64x64xf32>
    %27 = arith.addf %21, %26 : vector<64x64xf32>
    %28 = vector.extract_strided_slice %10 {offsets = [1, 0, 0], sizes = [8, 8, 32], strides = [1, 1, 1]} : vector<10x10x32xbf16> to vector<8x8x32xbf16>
    %29 = vector.shape_cast %28 : vector<8x8x32xbf16> to vector<64x32xbf16>
    %c3 = arith.constant 3 : index
    %c0_12 = arith.constant 0 : index
    %c0_13 = arith.constant 0 : index
    %30 = vector.load %arg2[%c3, %c0_12, %c0_13] : memref<9x32x64xbf16, #tpu.memory_space<vmem>>, vector<1x32x64xbf16>
    %31 = vector.shape_cast %30 : vector<1x32x64xbf16> to vector<32x64xbf16>
    %cst_14 = arith.constant dense<0.000000e+00> : vector<64x64xf32>
    %32 = tpu.matmul %29, %31, %cst_14 {dimension_numbers = #tpu.dot_dimension_numbers<[1], [0], [0], [1], [0, 0, 1, 1], [], []>} : vector<64x32xbf16>, vector<32x64xbf16>, vector<64x64xf32> -> vector<64x64xf32>
    %33 = arith.addf %27, %32 : vector<64x64xf32>
    %34 = vector.extract_strided_slice %10 {offsets = [1, 1, 0], sizes = [8, 8, 32], strides = [1, 1, 1]} : vector<10x10x32xbf16> to vector<8x8x32xbf16>
    %35 = vector.shape_cast %34 : vector<8x8x32xbf16> to vector<64x32xbf16>
    %c4 = arith.constant 4 : index
    %c0_15 = arith.constant 0 : index
    %c0_16 = arith.constant 0 : index
    %36 = vector.load %arg2[%c4, %c0_15, %c0_16] : memref<9x32x64xbf16, #tpu.memory_space<vmem>>, vector<1x32x64xbf16>
    %37 = vector.shape_cast %36 : vector<1x32x64xbf16> to vector<32x64xbf16>
    %cst_17 = arith.constant dense<0.000000e+00> : vector<64x64xf32>
    %38 = tpu.matmul %35, %37, %cst_17 {dimension_numbers = #tpu.dot_dimension_numbers<[1], [0], [0], [1], [0, 0, 1, 1], [], []>} : vector<64x32xbf16>, vector<32x64xbf16>, vector<64x64xf32> -> vector<64x64xf32>
    %39 = arith.addf %33, %38 : vector<64x64xf32>
    %40 = vector.extract_strided_slice %10 {offsets = [1, 2, 0], sizes = [8, 8, 32], strides = [1, 1, 1]} : vector<10x10x32xbf16> to vector<8x8x32xbf16>
    %41 = vector.shape_cast %40 : vector<8x8x32xbf16> to vector<64x32xbf16>
    %c5 = arith.constant 5 : index
    %c0_18 = arith.constant 0 : index
    %c0_19 = arith.constant 0 : index
    %42 = vector.load %arg2[%c5, %c0_18, %c0_19] : memref<9x32x64xbf16, #tpu.memory_space<vmem>>, vector<1x32x64xbf16>
    %43 = vector.shape_cast %42 : vector<1x32x64xbf16> to vector<32x64xbf16>
    %cst_20 = arith.constant dense<0.000000e+00> : vector<64x64xf32>
    %44 = tpu.matmul %41, %43, %cst_20 {dimension_numbers = #tpu.dot_dimension_numbers<[1], [0], [0], [1], [0, 0, 1, 1], [], []>} : vector<64x32xbf16>, vector<32x64xbf16>, vector<64x64xf32> -> vector<64x64xf32>
    %45 = arith.addf %39, %44 : vector<64x64xf32>
    %46 = vector.extract_strided_slice %10 {offsets = [2, 0, 0], sizes = [8, 8, 32], strides = [1, 1, 1]} : vector<10x10x32xbf16> to vector<8x8x32xbf16>
    %47 = vector.shape_cast %46 : vector<8x8x32xbf16> to vector<64x32xbf16>
    %c6 = arith.constant 6 : index
    %c0_21 = arith.constant 0 : index
    %c0_22 = arith.constant 0 : index
    %48 = vector.load %arg2[%c6, %c0_21, %c0_22] : memref<9x32x64xbf16, #tpu.memory_space<vmem>>, vector<1x32x64xbf16>
    %49 = vector.shape_cast %48 : vector<1x32x64xbf16> to vector<32x64xbf16>
    %cst_23 = arith.constant dense<0.000000e+00> : vector<64x64xf32>
    %50 = tpu.matmul %47, %49, %cst_23 {dimension_numbers = #tpu.dot_dimension_numbers<[1], [0], [0], [1], [0, 0, 1, 1], [], []>} : vector<64x32xbf16>, vector<32x64xbf16>, vector<64x64xf32> -> vector<64x64xf32>
    %51 = arith.addf %45, %50 : vector<64x64xf32>
    %52 = vector.extract_strided_slice %10 {offsets = [2, 1, 0], sizes = [8, 8, 32], strides = [1, 1, 1]} : vector<10x10x32xbf16> to vector<8x8x32xbf16>
    %53 = vector.shape_cast %52 : vector<8x8x32xbf16> to vector<64x32xbf16>
    %c7 = arith.constant 7 : index
    %c0_24 = arith.constant 0 : index
    %c0_25 = arith.constant 0 : index
    %54 = vector.load %arg2[%c7, %c0_24, %c0_25] : memref<9x32x64xbf16, #tpu.memory_space<vmem>>, vector<1x32x64xbf16>
    %55 = vector.shape_cast %54 : vector<1x32x64xbf16> to vector<32x64xbf16>
    %cst_26 = arith.constant dense<0.000000e+00> : vector<64x64xf32>
    %56 = tpu.matmul %53, %55, %cst_26 {dimension_numbers = #tpu.dot_dimension_numbers<[1], [0], [0], [1], [0, 0, 1, 1], [], []>} : vector<64x32xbf16>, vector<32x64xbf16>, vector<64x64xf32> -> vector<64x64xf32>
    %57 = arith.addf %51, %56 : vector<64x64xf32>
    %58 = vector.extract_strided_slice %10 {offsets = [2, 2, 0], sizes = [8, 8, 32], strides = [1, 1, 1]} : vector<10x10x32xbf16> to vector<8x8x32xbf16>
    %59 = vector.shape_cast %58 : vector<8x8x32xbf16> to vector<64x32xbf16>
    %c8 = arith.constant 8 : index
    %c0_27 = arith.constant 0 : index
    %c0_28 = arith.constant 0 : index
    %60 = vector.load %arg2[%c8, %c0_27, %c0_28] : memref<9x32x64xbf16, #tpu.memory_space<vmem>>, vector<1x32x64xbf16>
    %61 = vector.shape_cast %60 : vector<1x32x64xbf16> to vector<32x64xbf16>
    %cst_29 = arith.constant dense<0.000000e+00> : vector<64x64xf32>
    %62 = tpu.matmul %59, %61, %cst_29 {dimension_numbers = #tpu.dot_dimension_numbers<[1], [0], [0], [1], [0, 0, 1, 1], [], []>} : vector<64x32xbf16>, vector<32x64xbf16>, vector<64x64xf32> -> vector<64x64xf32>
    %63 = arith.addf %57, %62 : vector<64x64xf32>
    %c0_30 = arith.constant 0 : index
    %c0_31 = arith.constant 0 : index
    %64 = vector.load %arg3[%c0_30, %c0_31] : memref<1x64xf32, #tpu.memory_space<vmem>>, vector<1x64xf32>
    %65 = vector.broadcast %64 : vector<1x64xf32> to vector<64x64xf32>
    %66 = arith.addf %63, %65 : vector<64x64xf32>
    %67 = arith.negf %66 : vector<64x64xf32>
    %68 = math.exp %67 : vector<64x64xf32>
    %cst_32 = arith.constant 1.000000e+00 : f32
    %69 = vector.broadcast %cst_32 : f32 to vector<64x64xf32>
    %70 = arith.addf %69, %68 : vector<64x64xf32>
    %71 = arith.divf %69, %70 : vector<64x64xf32>
    %72 = arith.mulf %66, %71 : vector<64x64xf32>
    %73 = arith.truncf %72 : vector<64x64xf32> to vector<64x64xbf16>
    %74 = vector.shape_cast %73 : vector<64x64xbf16> to vector<8x8x64xbf16>
    %c0_i32_33 = arith.constant 0 : i32
    %75 = arith.sitofp %c0_i32_33 : i32 to bf16
    %76 = vector.broadcast %75 : bf16 to vector<1x8x64xbf16>
    %77 = tpu.concatenate %76, %74 in 0 : vector<1x8x64xbf16>, vector<8x8x64xbf16> -> vector<9x8x64xbf16>
    %78 = vector.broadcast %75 : bf16 to vector<1x8x64xbf16>
    %79 = tpu.concatenate %77, %78 in 0 : vector<9x8x64xbf16>, vector<1x8x64xbf16> -> vector<10x8x64xbf16>
    %80 = vector.broadcast %75 : bf16 to vector<10x1x64xbf16>
    %81 = tpu.concatenate %80, %79 in 1 : vector<10x1x64xbf16>, vector<10x8x64xbf16> -> vector<10x9x64xbf16>
    %82 = vector.broadcast %75 : bf16 to vector<10x1x64xbf16>
    %83 = tpu.concatenate %81, %82 in 1 : vector<10x9x64xbf16>, vector<10x1x64xbf16> -> vector<10x10x64xbf16>
    %84 = vector.extract_strided_slice %83 {offsets = [0, 0, 0], sizes = [8, 8, 64], strides = [1, 1, 1]} : vector<10x10x64xbf16> to vector<8x8x64xbf16>
    %85 = vector.shape_cast %84 : vector<8x8x64xbf16> to vector<64x64xbf16>
    %c0_34 = arith.constant 0 : index
    %c0_35 = arith.constant 0 : index
    %c0_36 = arith.constant 0 : index
    %86 = vector.load %arg4[%c0_34, %c0_35, %c0_36] : memref<9x64x64xbf16, #tpu.memory_space<vmem>>, vector<1x64x64xbf16>
    %87 = vector.shape_cast %86 : vector<1x64x64xbf16> to vector<64x64xbf16>
    %cst_37 = arith.constant dense<0.000000e+00> : vector<64x64xf32>
    %88 = tpu.matmul %85, %87, %cst_37 {dimension_numbers = #tpu.dot_dimension_numbers<[1], [0], [0], [1], [0, 0, 1, 1], [], []>} : vector<64x64xbf16>, vector<64x64xbf16>, vector<64x64xf32> -> vector<64x64xf32>
    %89 = vector.extract_strided_slice %83 {offsets = [0, 1, 0], sizes = [8, 8, 64], strides = [1, 1, 1]} : vector<10x10x64xbf16> to vector<8x8x64xbf16>
    %90 = vector.shape_cast %89 : vector<8x8x64xbf16> to vector<64x64xbf16>
    %c1_38 = arith.constant 1 : index
    %c0_39 = arith.constant 0 : index
    %c0_40 = arith.constant 0 : index
    %91 = vector.load %arg4[%c1_38, %c0_39, %c0_40] : memref<9x64x64xbf16, #tpu.memory_space<vmem>>, vector<1x64x64xbf16>
    %92 = vector.shape_cast %91 : vector<1x64x64xbf16> to vector<64x64xbf16>
    %cst_41 = arith.constant dense<0.000000e+00> : vector<64x64xf32>
    %93 = tpu.matmul %90, %92, %cst_41 {dimension_numbers = #tpu.dot_dimension_numbers<[1], [0], [0], [1], [0, 0, 1, 1], [], []>} : vector<64x64xbf16>, vector<64x64xbf16>, vector<64x64xf32> -> vector<64x64xf32>
    %94 = arith.addf %88, %93 : vector<64x64xf32>
    %95 = vector.extract_strided_slice %83 {offsets = [0, 2, 0], sizes = [8, 8, 64], strides = [1, 1, 1]} : vector<10x10x64xbf16> to vector<8x8x64xbf16>
    %96 = vector.shape_cast %95 : vector<8x8x64xbf16> to vector<64x64xbf16>
    %c2_42 = arith.constant 2 : index
    %c0_43 = arith.constant 0 : index
    %c0_44 = arith.constant 0 : index
    %97 = vector.load %arg4[%c2_42, %c0_43, %c0_44] : memref<9x64x64xbf16, #tpu.memory_space<vmem>>, vector<1x64x64xbf16>
    %98 = vector.shape_cast %97 : vector<1x64x64xbf16> to vector<64x64xbf16>
    %cst_45 = arith.constant dense<0.000000e+00> : vector<64x64xf32>
    %99 = tpu.matmul %96, %98, %cst_45 {dimension_numbers = #tpu.dot_dimension_numbers<[1], [0], [0], [1], [0, 0, 1, 1], [], []>} : vector<64x64xbf16>, vector<64x64xbf16>, vector<64x64xf32> -> vector<64x64xf32>
    %100 = arith.addf %94, %99 : vector<64x64xf32>
    %101 = vector.extract_strided_slice %83 {offsets = [1, 0, 0], sizes = [8, 8, 64], strides = [1, 1, 1]} : vector<10x10x64xbf16> to vector<8x8x64xbf16>
    %102 = vector.shape_cast %101 : vector<8x8x64xbf16> to vector<64x64xbf16>
    %c3_46 = arith.constant 3 : index
    %c0_47 = arith.constant 0 : index
    %c0_48 = arith.constant 0 : index
    %103 = vector.load %arg4[%c3_46, %c0_47, %c0_48] : memref<9x64x64xbf16, #tpu.memory_space<vmem>>, vector<1x64x64xbf16>
    %104 = vector.shape_cast %103 : vector<1x64x64xbf16> to vector<64x64xbf16>
    %cst_49 = arith.constant dense<0.000000e+00> : vector<64x64xf32>
    %105 = tpu.matmul %102, %104, %cst_49 {dimension_numbers = #tpu.dot_dimension_numbers<[1], [0], [0], [1], [0, 0, 1, 1], [], []>} : vector<64x64xbf16>, vector<64x64xbf16>, vector<64x64xf32> -> vector<64x64xf32>
    %106 = arith.addf %100, %105 : vector<64x64xf32>
    %107 = vector.extract_strided_slice %83 {offsets = [1, 1, 0], sizes = [8, 8, 64], strides = [1, 1, 1]} : vector<10x10x64xbf16> to vector<8x8x64xbf16>
    %108 = vector.shape_cast %107 : vector<8x8x64xbf16> to vector<64x64xbf16>
    %c4_50 = arith.constant 4 : index
    %c0_51 = arith.constant 0 : index
    %c0_52 = arith.constant 0 : index
    %109 = vector.load %arg4[%c4_50, %c0_51, %c0_52] : memref<9x64x64xbf16, #tpu.memory_space<vmem>>, vector<1x64x64xbf16>
    %110 = vector.shape_cast %109 : vector<1x64x64xbf16> to vector<64x64xbf16>
    %cst_53 = arith.constant dense<0.000000e+00> : vector<64x64xf32>
    %111 = tpu.matmul %108, %110, %cst_53 {dimension_numbers = #tpu.dot_dimension_numbers<[1], [0], [0], [1], [0, 0, 1, 1], [], []>} : vector<64x64xbf16>, vector<64x64xbf16>, vector<64x64xf32> -> vector<64x64xf32>
    %112 = arith.addf %106, %111 : vector<64x64xf32>
    %113 = vector.extract_strided_slice %83 {offsets = [1, 2, 0], sizes = [8, 8, 64], strides = [1, 1, 1]} : vector<10x10x64xbf16> to vector<8x8x64xbf16>
    %114 = vector.shape_cast %113 : vector<8x8x64xbf16> to vector<64x64xbf16>
    %c5_54 = arith.constant 5 : index
    %c0_55 = arith.constant 0 : index
    %c0_56 = arith.constant 0 : index
    %115 = vector.load %arg4[%c5_54, %c0_55, %c0_56] : memref<9x64x64xbf16, #tpu.memory_space<vmem>>, vector<1x64x64xbf16>
    %116 = vector.shape_cast %115 : vector<1x64x64xbf16> to vector<64x64xbf16>
    %cst_57 = arith.constant dense<0.000000e+00> : vector<64x64xf32>
    %117 = tpu.matmul %114, %116, %cst_57 {dimension_numbers = #tpu.dot_dimension_numbers<[1], [0], [0], [1], [0, 0, 1, 1], [], []>} : vector<64x64xbf16>, vector<64x64xbf16>, vector<64x64xf32> -> vector<64x64xf32>
    %118 = arith.addf %112, %117 : vector<64x64xf32>
    %119 = vector.extract_strided_slice %83 {offsets = [2, 0, 0], sizes = [8, 8, 64], strides = [1, 1, 1]} : vector<10x10x64xbf16> to vector<8x8x64xbf16>
    %120 = vector.shape_cast %119 : vector<8x8x64xbf16> to vector<64x64xbf16>
    %c6_58 = arith.constant 6 : index
    %c0_59 = arith.constant 0 : index
    %c0_60 = arith.constant 0 : index
    %121 = vector.load %arg4[%c6_58, %c0_59, %c0_60] : memref<9x64x64xbf16, #tpu.memory_space<vmem>>, vector<1x64x64xbf16>
    %122 = vector.shape_cast %121 : vector<1x64x64xbf16> to vector<64x64xbf16>
    %cst_61 = arith.constant dense<0.000000e+00> : vector<64x64xf32>
    %123 = tpu.matmul %120, %122, %cst_61 {dimension_numbers = #tpu.dot_dimension_numbers<[1], [0], [0], [1], [0, 0, 1, 1], [], []>} : vector<64x64xbf16>, vector<64x64xbf16>, vector<64x64xf32> -> vector<64x64xf32>
    %124 = arith.addf %118, %123 : vector<64x64xf32>
    %125 = vector.extract_strided_slice %83 {offsets = [2, 1, 0], sizes = [8, 8, 64], strides = [1, 1, 1]} : vector<10x10x64xbf16> to vector<8x8x64xbf16>
    %126 = vector.shape_cast %125 : vector<8x8x64xbf16> to vector<64x64xbf16>
    %c7_62 = arith.constant 7 : index
    %c0_63 = arith.constant 0 : index
    %c0_64 = arith.constant 0 : index
    %127 = vector.load %arg4[%c7_62, %c0_63, %c0_64] : memref<9x64x64xbf16, #tpu.memory_space<vmem>>, vector<1x64x64xbf16>
    %128 = vector.shape_cast %127 : vector<1x64x64xbf16> to vector<64x64xbf16>
    %cst_65 = arith.constant dense<0.000000e+00> : vector<64x64xf32>
    %129 = tpu.matmul %126, %128, %cst_65 {dimension_numbers = #tpu.dot_dimension_numbers<[1], [0], [0], [1], [0, 0, 1, 1], [], []>} : vector<64x64xbf16>, vector<64x64xbf16>, vector<64x64xf32> -> vector<64x64xf32>
    %130 = arith.addf %124, %129 : vector<64x64xf32>
    %131 = vector.extract_strided_slice %83 {offsets = [2, 2, 0], sizes = [8, 8, 64], strides = [1, 1, 1]} : vector<10x10x64xbf16> to vector<8x8x64xbf16>
    %132 = vector.shape_cast %131 : vector<8x8x64xbf16> to vector<64x64xbf16>
    %c8_66 = arith.constant 8 : index
    %c0_67 = arith.constant 0 : index
    %c0_68 = arith.constant 0 : index
    %133 = vector.load %arg4[%c8_66, %c0_67, %c0_68] : memref<9x64x64xbf16, #tpu.memory_space<vmem>>, vector<1x64x64xbf16>
    %134 = vector.shape_cast %133 : vector<1x64x64xbf16> to vector<64x64xbf16>
    %cst_69 = arith.constant dense<0.000000e+00> : vector<64x64xf32>
    %135 = tpu.matmul %132, %134, %cst_69 {dimension_numbers = #tpu.dot_dimension_numbers<[1], [0], [0], [1], [0, 0, 1, 1], [], []>} : vector<64x64xbf16>, vector<64x64xbf16>, vector<64x64xf32> -> vector<64x64xf32>
    %136 = arith.addf %130, %135 : vector<64x64xf32>
    %c0_70 = arith.constant 0 : index
    %c0_71 = arith.constant 0 : index
    %137 = vector.load %arg5[%c0_70, %c0_71] : memref<1x64xf32, #tpu.memory_space<vmem>>, vector<1x64xf32>
    %138 = vector.broadcast %137 : vector<1x64xf32> to vector<64x64xf32>
    %139 = arith.addf %136, %138 : vector<64x64xf32>
    %140 = arith.negf %139 : vector<64x64xf32>
    %141 = math.exp %140 : vector<64x64xf32>
    %cst_72 = arith.constant 1.000000e+00 : f32
    %142 = vector.broadcast %cst_72 : f32 to vector<64x64xf32>
    %143 = arith.addf %142, %141 : vector<64x64xf32>
    %144 = arith.divf %142, %143 : vector<64x64xf32>
    %145 = arith.mulf %139, %144 : vector<64x64xf32>
    %146 = arith.truncf %145 : vector<64x64xf32> to vector<64x64xbf16>
    %c0_73 = arith.constant 0 : index
    %c0_74 = arith.constant 0 : index
    %147 = vector.load %arg6[%c0_73, %c0_74] : memref<64x128xbf16, #tpu.memory_space<vmem>>, vector<64x128xbf16>
    %cst_75 = arith.constant dense<0.000000e+00> : vector<64x128xf32>
    %148 = tpu.matmul %146, %147, %cst_75 {dimension_numbers = #tpu.dot_dimension_numbers<[1], [0], [0], [1], [0, 0, 1, 1], [], []>} : vector<64x64xbf16>, vector<64x128xbf16>, vector<64x128xf32> -> vector<64x128xf32>
    %c0_76 = arith.constant 0 : index
    %c0_77 = arith.constant 0 : index
    %149 = vector.load %arg7[%c0_76, %c0_77] : memref<1x128xf32, #tpu.memory_space<vmem>>, vector<1x128xf32>
    %150 = vector.broadcast %149 : vector<1x128xf32> to vector<64x128xf32>
    %151 = arith.addf %148, %150 : vector<64x128xf32>
    %152 = vector.shape_cast %151 : vector<64x128xf32> to vector<1x8x8x128xf32>
    %c0_78 = arith.constant 0 : index
    %c0_79 = arith.constant 0 : index
    %c0_80 = arith.constant 0 : index
    %c0_81 = arith.constant 0 : index
    %153 = vector.load %arg8[%c0_78, %c0_79, %c0_80, %c0_81] : memref<1x8x8x128xf32, #tpu.memory_space<vmem>>, vector<1x8x8x128xf32>
    tpu.vector_store %arg8[%c0_78, %c0_79, %c0_80, %c0_81], %152 {strides = array<i32>} : memref<1x8x8x128xf32, #tpu.memory_space<vmem>>, vector<1x8x8x128xf32>,
    return
  }
  func.func @transform_0(%arg0: i32) -> (i32, i32, i32, i32) {
    %c0_i32 = arith.constant 0 : i32
    %c0_i32_0 = arith.constant 0 : i32
    %c0_i32_1 = arith.constant 0 : i32
    %c0_i32_2 = arith.constant 0 : i32
    return %arg0, %c0_i32, %c0_i32_0, %c0_i32_1 : i32, i32, i32, i32
  }
  func.func @transform_1(%arg0: i32) -> (i32, i32, i32) {
    %c0_i32 = arith.constant 0 : i32
    %c0_i32_0 = arith.constant 0 : i32
    %c0_i32_1 = arith.constant 0 : i32
    %c0_i32_2 = arith.constant 0 : i32
    return %c0_i32, %c0_i32_0, %c0_i32_1 : i32, i32, i32
  }
  func.func @transform_2(%arg0: i32) -> (i32, i32) {
    %c0_i32 = arith.constant 0 : i32
    %c0_i32_0 = arith.constant 0 : i32
    %c0_i32_1 = arith.constant 0 : i32
    return %c0_i32, %c0_i32_0 : i32, i32
  }
  func.func @transform_3(%arg0: i32) -> (i32, i32, i32) {
    %c0_i32 = arith.constant 0 : i32
    %c0_i32_0 = arith.constant 0 : i32
    %c0_i32_1 = arith.constant 0 : i32
    %c0_i32_2 = arith.constant 0 : i32
    return %c0_i32, %c0_i32_0, %c0_i32_1 : i32, i32, i32
  }
  func.func @transform_4(%arg0: i32) -> (i32, i32) {
    %c0_i32 = arith.constant 0 : i32
    %c0_i32_0 = arith.constant 0 : i32
    %c0_i32_1 = arith.constant 0 : i32
    return %c0_i32, %c0_i32_0 : i32, i32
  }
  func.func @transform_5(%arg0: i32) -> (i32, i32) {
    %c0_i32 = arith.constant 0 : i32
    %c0_i32_0 = arith.constant 0 : i32
    %c0_i32_1 = arith.constant 0 : i32
    return %c0_i32, %c0_i32_0 : i32, i32
  }
  func.func @transform_6(%arg0: i32) -> (i32, i32) {
    %c0_i32 = arith.constant 0 : i32
    %c0_i32_0 = arith.constant 0 : i32
    %c0_i32_1 = arith.constant 0 : i32
    return %c0_i32, %c0_i32_0 : i32, i32
  }
  func.func @transform_7(%arg0: i32) -> (i32, i32, i32, i32) {
    %c0_i32 = arith.constant 0 : i32
    %c0_i32_0 = arith.constant 0 : i32
    %c0_i32_1 = arith.constant 0 : i32
    %c0_i32_2 = arith.constant 0 : i32
    return %arg0, %c0_i32, %c0_i32_0, %c0_i32_1 : i32, i32, i32, i32
  }
}

</mosaic_0001>

<bundles_post_ra>
// kernel: tpu_custom_call.1
= control target key start
LH: loop header
LB: loop body
LE: loop exit
PB: predicated region body
PF: predicated region fallthrough
CT: control target
= control target key end

     0   :  { %s4779_s0 = inlined_call_operand.hbm [shape: bf16[2,8,8,32], index: 0, kind: input, shape index: {}]   ;;  %s4780_s1 = inlined_call_operand.hbm [shape: bf16[9,32,64], index: 1, kind: input, shape index: {}]   ;;  %s4781_s2 = inlined_call_operand.vmem [shape: f32[1,64], index: 2, kind: input, shape index: {}]   ;;  %s4782_s3 = inlined_call_operand.hbm [shape: bf16[9,64,64], index: 3, kind: input, shape index: {}]   ;;  %s4783_s4 = inlined_call_operand.vmem [shape: f32[1,64], index: 4, kind: input, shape index: {}]   ;;  %s4784_s5 = inlined_call_operand.hbm [shape: bf16[64,128], index: 5, kind: input, shape index: {}]   ;;  %s4785_s6 = inlined_call_operand.vmem [shape: f32[1,128], index: 6, kind: input, shape index: {}]   ;;  %s4786_s7 = inlined_call_operand.hbm [shape: f32[2,8,8,128], index: 7, kind: output, shape index: {}]  }
   0x1   :  { %4789 = sst [smem:[#allocation15_spill]] %s4780_s1 }
   0x2   :  { %12 = vsyncpa [#allocation3], 0 }
   0x3   :  { %14 = vsyncpa [#allocation3 + $0x1], 0 }
   0x4   :  { %15 = vsyncpa [#allocation6], 0 }
   0x5   :  { %16 = vsyncpa [#allocation9], 0 }
   0x6   :  { %17 = vsyncpa [#allocation4], 0 }
   0x7   :  { %19 = vsyncpa [#allocation4 + $0x1], 0  ;;  %s3644_s24 = smov 0   ;;  %s3646_s25 = smov 0  }
   0x8   :  { %s3648_s26 = smov 0   ;;  %s3650_s27 = smov 0  }
   0x9 LB: > { %s3665_s28 = sadd.s32 4294967295, %s3594_s27   ;;  %s2824_s29 = sadd.s32 4294967294, %s3594_s27   ;;  %s3594_s27 = sphi %s3650_s27, %s4827_s27   ;;  %s3590_s26 = sphi %s3648_s26, %s4826_s26   ;;  %s3586_s25 = sphi %s3646_s25, %s4825_s25   ;;  %s3582_s24 = sphi %s3644_s24, %s4824_s24  }
   0xa   : > { %p45_p0 = scmp.ne.s32.totalorder %s3586_s25, %s3582_s24  ;;  %p46_p1 = scmp.eq.s32.totalorder %s3665_s28, 0 }
   0xb   : > { %p195_p2 = scmp.eq.s32.totalorder %s3665_s28, 1  ;;  %p201_p3 = scmp.eq.s32.totalorder %s2824_s29, 1 }
   0xc   : > { %p3674_p4 = por %p46_p1, %p45_p0  ;;  %p2825_p5 = scmp.ge.s32.totalorder %s3594_s27, 1 }
   0xd   : > { %p3679_p6 = por %p201_p3, %p45_p0  ;;  %p208_p7 = scmp.lt.s32.totalorder %s3594_s27, 3 }
   0xe   : > { %s4792_s1 = sld [smem:[#allocation15_spill]]  ;;  %s3596_s13 = smov [#allocation5]  }
   0xf   : > { %p3687_p8 = pnand %p2825_p5, %p208_p7  ;;  %s221_s14 = sshll.u32 %s3596_s13, 4  ;;  %s222_s14 = int_to_ptr.vmem [resolvable:$true] %s221_s14 }
  0x10   : > { %s236_s18 = sshll.u32 %s4782_s3, 4  ;;  %s4787_s19 = smov 64   ;;  %s237_s18 = int_to_ptr.hbm [resolvable:$true] %s236_s18 }
  0x11   : > { %p3267_p9 = pneg %p3687_p8  ;;  %s4788_s20 = smov 4  }
  0x12   : > { %s3599_s21 = smov [#allocation7]   ;;  %s253_s9 = sshll.u32 %s4784_s5, 4  ;;  %s254_s9 = int_to_ptr.hbm [resolvable:$true] %s253_s9 }
  0x13   : > { %p3695_p10 = pnand %p3267_p9, %p46_p1  ;;  %s238_s22 = sshll.u32 %s3599_s21, 4  ;;  %s239_s22 = int_to_ptr.vmem [resolvable:$true] %s238_s22 }
  0x14   : > { %s219_s11 = sshll.u32 %s4792_s1, 4  ;;  %s3600_s10 = smov [#allocation8]   ;;  %s220_s11 = int_to_ptr.hbm [resolvable:$true] %s219_s11 }
  0x15   : > { %3270 = dma.hbm_to_vmem [thread:$0]  (!%p3695_p10), %s220_s11, 2304, %s222_s14, [#allocation6], %s4787_s19, %s4787_s19, %s4788_s20  }
  0x16   : > { %3273 = dma.hbm_to_vmem [thread:$0]  (!%p3695_p10), %s237_s18, 4608, %s239_s22, [#allocation6], %s4787_s19, %s4787_s19, %s4788_s20  }
  0x17   : > { %s255_s11 = sshll.u32 %s3600_s10, 4  ;;  %s3717_s13 = sadd.s32 1, %s3594_s27   ;;  %s256_s11 = int_to_ptr.vmem [resolvable:$true] %s255_s11 }
  0x18   : > { %3276 = dma.hbm_to_vmem [thread:$0]  (!%p3695_p10), %s254_s9, 512, %s256_s11, [#allocation9], %s4787_s19, %s4787_s19, %s4788_s20  }
  0x19   : > { %s29_s14 = ssub.s32 %s3594_s27, %s3717_s13  ;;  %s32_s16 = sadd.s32 1, %s3590_s26 }
  0x1a   : > { %p30_p12 = scmp.eq.s32.totalorder %s29_s14, 0  ;;  %p39_p13 = scmp.ne.s32.totalorder %s3590_s26, %s3586_s25 }
  0x1b   : > { %p40_p0 = scmp.eq.s32.totalorder %s3594_s27, 0  ;;  %p3288_p5 = scmp.lt.s32.totalorder %s3594_s27, 2 }
  0x1c   : > { %s3731_s17 = scalar_select %p30_p12, %s3590_s26, %s32_s16  }
  0x1d   : > { %p3735_p3 = por %p195_p2, %p39_p13  ;;  %s272_s21 = sand.u32 1, %s3590_s26  }
  0x1e   : > { %s3185_s15 = sshll.u32 %s3594_s27, 5  ;;  %p41_p7 = por %p40_p0, %p39_p13 }
  0x1f   : > { %s2830_s22 = sshll.u32 %s272_s21, 5  ;;  %s281_s9 = scalar_lea.hbm %s4779_s0, %s3185_s15 }
  0x20   : > { %s282_s10 = sshll.u32 %s281_s9, 4  ;;  %s276_s11 = scalar_lea.vmem [#allocation2], %s2830_s22  ;;  %s283_s10 = int_to_ptr.hbm [resolvable:$true] %s282_s10 }
  0x21   : > { %s284_s14 = sshll.u32 %s276_s11, 4  ;;  %p3745_p9 = pnand %p3288_p5, %p41_p7  ;;  %s285_s14 = int_to_ptr.vmem [resolvable:$true] %s284_s14 }
  0x22   : > { %s273_s19 = scalar_lea.sflag [#allocation3], %s272_s21  ;;  %s3490_s20 = sshra.s32 %s283_s10, 4  ;;  %s3491_s20 = int_to_ptr.hbm [resolvable:$true] %s3490_s20 }
  0x23   : > { %s3492_s1 = scalar_lea.hbm %s3491_s20, 32  ;;  %p3494_p10 = pneg %p3745_p9 }
  0x24   : > { %p3493_p2 = scmp.ne.s32.totalorder %s3491_s20, %s3492_s1  ;;  %s3497_s22 = scalar_lea.hbm %s4779_s0, 64 }
  0x25   : > { %p3498_p0 = scmp.lt.s32.totalorder %s3491_s20, %s4779_s0  ;;  %p3499_p5 = scmp.lt.s32.totalorder %s3497_s22, %s3492_s1 }
  0x26   : > { %p3495_p12 = pnand %p3494_p10, %p3493_p2 }
  0x27   : > { %p3500_p7 = por %p3499_p5, %p3498_p0 }
  0x28   : > { %p3496_p13 = pneg %p3495_p12 }
  0x2a   : > { %p3501_p11 = pnand %p3500_p7, %p3496_p13 }
  0x2c   : > { %3504 = shalt.err (!%p3501_p11)
}
  0x2d   : > { %s4797_s21 = smov 4   ;;  %s4798_s11 = smov 64  }
  0x2e   : > { %3280 = dma.hbm_to_vmem [thread:$0]  (!%p3745_p9), %s283_s10, 512, %s285_s14, %s273_s19, %s4798_s11, %s4798_s11, %s4797_s21  }
  0x2f   : > { %296 = sbr.rel (%p3687_p8) target bundleno = 910 (0x38e), region = 48  ;;  %s3765_s15 = sand.u32 (!%p3687_p8), 1, %s3586_s25  }
  0x30   : > { %s2834_s20 = sshll.u32 (!%p3687_p8), %s3765_s15, 5  ;;  %s299_s1 = scalar_lea.sflag (!%p3687_p8), [#allocation3], %s3765_s15 }
  0x31   : > { %s3769_s23 = scalar_lea.vmem (!%p3687_p8), [#allocation2], %s2834_s20 }
  0x34   : > { %3565 = dma.done.wait (%p3674_p4), %s299_s1, 512  }
  0x35   : > { %3567 = vsyncadd (%p3674_p4), %s299_s1, 4294966784 }
  0x36   : > { %3569 = dma.done.wait (%p46_p1), [#allocation6], 6912  }
  0x37   : > { %3571 = vsyncadd (%p46_p1), [#allocation6], 4294960384 }
  0x38   : > { %3573 = dma.done.wait (%p46_p1), [#allocation9], 512  }
  0x39   : > { %3575 = vsyncadd (%p46_p1), [#allocation9], 4294966784  ;;  %vm430_vm0 = vcmask 1040384   ;;  %vm431_vm1 = vsmask.f32 256  ;;  %v3601_v0 = vmov 0  }
  0x3a   : > { %v361_v1 = vrot.slane %v3601_v0, 7  ;;  %vm3783_vm2 = vmand %vm430_vm0, %vm431_vm1  ;;  %vm442_vm3 = vcmask 1044480   ;;  %vm443_vm4 = vsmask.f32 4352  ;;  %v3189_v8 = vld [vmem:[#allocation5 + $0x18] sm:$0xff]  ;;  %v3797_v9 = vld [vmem:[#allocation5 + $0x28] sm:$0xff] }
  0x3b   : > { %vm3787_vm5 = vmand %vm442_vm3, %vm443_vm4  ;;  %vm498_vm6 = vsmask.f32 3328  ;;  %v3188_v12 = vld [vmem:[#allocation5 + $0x10] sm:$0xff]  ;;  %v3187_v13 = vld [vmem:[#allocation5 + $0x8] sm:$0xff]  ;;  %vm499_vm7 = vsmask.f32 7440  ;;  %661 = vmatpush.bf16.msra.mxu0 %v3189_v8  ;;  %3245 = vmatpush.bf16.msra.mxu3 %v3189_v8 }
  0x3c   : > { %v433_v4 = vsel %vm3783_vm2, 0, %v361_v1  ;;  %v350_v14 = vld [vmem:[%s3769_s23] sm:$0xf]  ;;  %v351_v19 = vld [vmem:[%s3769_s23 + $0x4] sm:$0xf]  ;;  %3249 = vmatpush.bf16.msra.mxu2 %v3797_v9  ;;  %3247 = vmatpush.bf16.msra.mxu1 %v3187_v13  ;;  %v3193_v29 = vld [vmem:[#allocation5 + $0x38] sm:$0xff] }
  0x3d   : > { %v445_v5 = vsel %vm3787_vm5, %v433_v4, 0  ;;  %v366_v15 = vshrl.u32 %v350_v14, 16  ;;  %v369_v16 = vshll.u32 %v350_v14, 16  ;;  %v3810_v20 = vld [vmem:[#allocation5 + $0x20] sm:$0xff]  ;;  %v352_v22 = vld [vmem:[%s3769_s23 + $0x8] sm:$0xf]  ;;  %vm3819_vm8 = vmor %vm498_vm6, %vm499_vm7 }
  0x3e   : > { %v3795_v6 = vunpack.c.l.b16 %v445_v5  ;;  %v467_v7 = vunpack.c.h.b16 %v445_v5  ;;  %v373_v23 = vshrl.u32 %v351_v19, 16  ;;  %v376_v24 = vshll.u32 %v351_v19, 16  ;;  %v3186_v30 = vld [vmem:[#allocation5] sm:$0xff]  ;;  %v353_v34 = vld [vmem:[%s3769_s23 + $0xc] sm:$0xf]  ;;  %s2838_s14 = sshll.u32 %s3765_s15, 6 }
  0x3f   : > { %v368_v25 = vrot.slane %v366_v15, 7  ;;  %v380_v28 = vshrl.u32 %v352_v22, 16  ;;  %v383_v33 = vshll.u32 %v352_v22, 16  ;;  %662 = vmatpush.bf16.msra.mxu0 %v3188_v12  ;;  %3246 = vmatpush.bf16.msra.mxu3 %v3188_v12  ;;  %v354_v38 = vld [vmem:[%s3769_s23 + $0x10] sm:$0xf]  ;;  %v387_v39 = vshrl.u32 %v353_v34, 16 }
  0x40   : > { %v3801_v10 = vpack.c.b16 %v3795_v6, %v3795_v6  ;;  %v3803_v11 = vpack.c.b16 %v467_v7, %v467_v7  ;;  %v375_v32 = vrot.slane %v373_v23, 7  ;;  %3250 = vmatpush.bf16.msra.mxu2 %v3810_v20  ;;  %v390_v42 = vshll.u32 %v353_v34, 16  ;;  %3248 = vmatpush.bf16.msra.mxu1 %v3186_v30  ;;  %s348_s29 = scalar_lea.vmem [#allocation10], %s2838_s14  ;;  %s3244_s9 = sshll.u32 %s3665_s28, 6 }
  0x41   : > { %v371_v35 = vor.u32 %v369_v16, %v368_v25  ;;  %v382_v37 = vrot.slane %v380_v28, 7  ;;  %v394_v43 = vshrl.u32 %v354_v38, 16  ;;  %vm741_vm9 = vcmask 1042432   ;;  %s2718_s20 = scalar_lea.hbm %s4786_s7, %s3244_s9  ;;  %s2719_s1 = sshll.u32 %s348_s29, 4  ;;  %s2720_s1 = int_to_ptr.vmem [resolvable:$true] %s2719_s1 }
  0x42   : > { %v502_v17 = vshrl.u32 %v3801_v10, 16  ;;  %v505_v18 = vshll.u32 %v3801_v10, 16  ;;  %v511_v21 = vshll.u32 %v3803_v11, 16  ;;  %v378_v41 = vor.u32 %v376_v24, %v375_v32  ;;  %s2707_s30 = scalar_lea.sflag [#allocation4], %s3765_s15  ;;  %s3540_s14 = scalar_lea.hbm %s4786_s7, 128 }
  0x43   : > { %895 = vmatpush.bf16.msrb.mxu3 %v3193_v29  ;;  %v434_v44 = vsel %vm3783_vm2, 0, %v371_v35  ;;  %v385_v46 = vor.u32 %v383_v33, %v382_v37  ;;  %718 = vmatpush.bf16.msrb.mxu0 %v3187_v13  ;;  %v389_v47 = vrot.slane %v387_v39, 7  ;;  %vm642_vm10 = vcmask 261120  }
  0x44   : > { %v504_v26 = vrot.slane %v502_v17, 4  ;;  %v507_v27 = vrot.slane %v505_v18, 5  ;;  %v513_v31 = vrot.slane %v511_v21, 5  ;;  %v446_v48 = vsel %vm3787_vm5, %v434_v44, 0  ;;  %v3192_v17 = vld [vmem:[#allocation5 + $0x30] sm:$0xff] }
  0x45   : > { %v435_v49 = vsel %vm3783_vm2, 0, %v378_v41  ;;  %v396_v50 = vrot.slane %v394_v43, 7  ;;  %v397_v51 = vshll.u32 %v354_v38, 16  ;;  %v3829_v52 = vunpack.c.l.b16 %v446_v48 }
  0x46   : > { %v508_v36 = vor.u32 %v507_v27, %v504_v26  ;;  %v469_v53 = vunpack.c.h.b16 %v446_v48  ;;  %v436_v55 = vsel %vm3783_vm2, 0, %v385_v46  ;;  %v447_v56 = vsel %vm3787_vm5, %v435_v49, 0 }
  0x47   : > { %v448_v57 = vsel %vm3787_vm5, %v436_v55, 0  ;;  %vm742_vm11 = vcmask 1046532   ;;  %v392_v58 = vor.u32 %v390_v42, %v389_v47  ;;  %v3841_v59 = vpack.c.b16 %v3829_v52, %v3829_v52  ;;  %719 = vmatpush.bf16.msrb.mxu0 %v3186_v30  ;;  %896 = vmatpush.bf16.msrb.mxu3 %v3192_v17 }
  0x48   : > { %v509_v45 = vrot.slane %v508_v36, 4  ;;  %v3843_v60 = vpack.c.b16 %v469_v53, %v469_v53  ;;  %v3845_v61 = vunpack.c.l.b16 %v447_v56  ;;  %v471_v62 = vunpack.c.h.b16 %v447_v56  ;;  %vm3868_vm12 = vmor %vm741_vm9, %vm742_vm11 }
  0x49   : > { %v3849_v0 = vunpack.c.l.b16 %v448_v57  ;;  %v473_v1 = vunpack.c.h.b16 %v448_v57  ;;  %v399_v4 = vor.u32 %v397_v51, %v396_v50  ;;  %v516_v5 = vshrl.u32 %v3841_v59, 16 }
  0x4a   : > { %v514_v54 = vsel %vm3819_vm8, %v509_v45, %v513_v31  ;;  %v519_v7 = vshll.u32 %v3841_v59, 16  ;;  %v525_v8 = vshll.u32 %v3843_v60, 16  ;;  %v437_v12 = vsel %vm3783_vm2, 0, %v392_v58 }
  0x4b   : > { %v3847_v63 = vunpack.c.l.b16 %v514_v54  ;;  %v486_v13 = vpack.c.b16 %v3845_v61, %v3845_v61  ;;  %v487_v14 = vpack.c.b16 %v471_v62, %v471_v62  ;;  %v488_v15 = vpack.c.b16 %v3849_v0, %v3849_v0 }
  0x4c   : > { %v489_v16 = vpack.c.b16 %v473_v1, %v473_v1  ;;  %v518_v18 = vrot.slane %v516_v5, 4  ;;  %v521_v19 = vrot.slane %v519_v7, 5  ;;  %v527_v21 = vrot.slane %v525_v8, 5  ;;  %v355_v5 = vld [vmem:[%s3769_s23 + $0x14] sm:$0xf] }
  0x4d   : > { %v3862_v22 = vpack.c.b16 %v3849_v0, %v3845_v61  ;;  %v530_v23 = vshrl.u32 %v486_v13, 16  ;;  %v533_v24 = vshll.u32 %v486_v13, 16  ;;  %v539_v25 = vshll.u32 %v487_v14, 16 }
  0x4e   : > { %v544_v26 = vshrl.u32 %v488_v15, 16  ;;  %v522_v27 = vor.u32 %v521_v19, %v518_v18  ;;  %v547_v28 = vshll.u32 %v488_v15, 16  ;;  %v553_v29 = vshll.u32 %v489_v16, 16 }
  0x4f   : > { %v2865_v30 = vrot.slane %v486_v13, 9  ;;  %2860 = vmatmul.msk.bf16.vlgmr.msra.gmra.mxu1 %vm642_vm10, %v3862_v22  ;;  %v532_v31 = vrot.slane %v530_v23, 4  ;;  %v535_v32 = vrot.slane %v533_v24, 5  ;;  %v541_v33 = vrot.slane %v539_v25, 5 }
  0x50   : > { %v546_v34 = vrot.slane %v544_v26, 4  ;;  %v523_v36 = vrot.slane %v522_v27, 4  ;;  %v549_v37 = vrot.slane %v547_v28, 5  ;;  %v555_v38 = vrot.slane %v553_v29, 5 }
  0x51   : > { %v754_v39 = vrot.slane %v487_v14, 5  ;;  %v536_v41 = vor.u32 %v535_v32, %v532_v31  ;;  %v2866_v42 = vrot.slane %v488_v15, 9  ;;  %v758_v43 = vrot.slane %v489_v16, 5 }
  0x52   : > { %v438_v44 = vsel %vm3783_vm2, 0, %v399_v4  ;;  %v528_v45 = vsel %vm3819_vm8, %v523_v36, %v527_v21  ;;  %v550_v46 = vor.u32 %v549_v37, %v546_v34  ;;  %v449_v48 = vsel %vm3787_vm5, %v437_v12, 0  ;;  %v356_v34 = vld [vmem:[%s3769_s23 + $0x18] sm:$0xf] }
  0x53   : > { %v3878_v47 = vsel %vm3868_vm12, %v2865_v30, %v754_v39  ;;  %v3882_v49 = vunpack.c.l.b16 %v528_v45  ;;  %v537_v50 = vrot.slane %v536_v41, 4  ;;  %v3886_v51 = vsel %vm3868_vm12, %v2866_v42, %v758_v43  ;;  %v3199_v41 = vld [vmem:[#allocation5 + $0x68] sm:$0xff] }
  0x54   : > { %v783_v53 = vunpack.c.l.b16 %v3878_v47  ;;  %v551_v54 = vrot.slane %v550_v46, 4  ;;  %v784_v55 = vunpack.c.l.b16 %v3886_v51  ;;  %v450_v56 = vsel %vm3787_vm5, %v438_v44, 0  ;;  %1116 = vmatpush.bf16.msrb.mxu2 %v3199_v41 }
  0x55   : > { %v3892_v57 = vunpack.c.l.b16 %v449_v48  ;;  %v626_v58 = vpack.c.b16 %v3882_v49, %v3847_v63  ;;  %v542_v62 = vsel %vm3819_vm8, %v537_v50, %v541_v33  ;;  %v475_v1 = vunpack.c.h.b16 %v449_v48 }
  0x56   : > { %v3898_v4 = vunpack.c.l.b16 %v450_v56  ;;  %v556_v7 = vsel %vm3819_vm8, %v551_v54, %v555_v38  ;;  %v3903_v8 = vunpack.c.l.b16 %v542_v62  ;;  %v3909_v12 = vpack.c.b16 %v784_v55, %v783_v53 }
  0x57   : > { %v477_v13 = vunpack.c.h.b16 %v450_v56  ;;  %2847 = vmatmul.msk.bf16.vlgmr.msra.gmra.mxu0 %vm642_vm10, %v626_v58  ;;  %v3912_v14 = vunpack.c.l.b16 %v556_v7  ;;  %v490_v15 = vpack.c.b16 %v3892_v57, %v3892_v57  ;;  %v491_v16 = vpack.c.b16 %v475_v1, %v475_v1 }
  0x58   : > { %v492_v17 = vpack.c.b16 %v3898_v4, %v3898_v4  ;;  %2880 = vmatmul.msk.bf16.vlgmr.msra.gmra.mxu2 %vm642_vm10, %v3909_v12  ;;  %v3922_v19 = vpack.c.b16 %v3898_v4, %v3892_v57  ;;  %v401_v21 = vshrl.u32 %v355_v5, 16  ;;  %823 = vmatpush.bf16.msra.mxu0 %v3797_v9  ;;  %v404_v48 = vshll.u32 %v355_v5, 16 }
  0x59   : > { %v493_v18 = vpack.c.b16 %v477_v13, %v477_v13  ;;  %v3926_v23 = vpack.c.b16 %v3912_v14, %v3903_v8  ;;  %v558_v24 = vshrl.u32 %v490_v15, 16  ;;  %v561_v25 = vshll.u32 %v490_v15, 16 }
  0x5a   : > { %v567_v26 = vshll.u32 %v491_v16, 16  ;;  %v572_v27 = vshrl.u32 %v492_v17, 16  ;;  %v575_v28 = vshll.u32 %v492_v17, 16  ;;  %v2867_v30 = vrot.slane %v490_v15, 9 }
  0x5b   : > { %v581_v29 = vshll.u32 %v493_v18, 16  ;;  %2848 = vmatmul.msk.bf16.vlgmr.msra.gmra.mxu3 %vm642_vm10, %v3926_v23  ;;  %v560_v31 = vrot.slane %v558_v24, 4  ;;  %v563_v32 = vrot.slane %v561_v25, 5  ;;  %v762_v33 = vrot.slane %v491_v16, 5 }
  0x5c   : > { %v569_v36 = vrot.slane %v567_v26, 5  ;;  %v574_v37 = vrot.slane %v572_v27, 4  ;;  %v577_v38 = vrot.slane %v575_v28, 5  ;;  %v2868_v39 = vrot.slane %v492_v17, 9  ;;  %824 = vmatpush.bf16.msra.mxu0 %v3810_v20  ;;  %v3195_v28 = vld [vmem:[#allocation5 + $0x48] sm:$0xff] }
  0x5d   : > { %v564_v42 = vor.u32 %v563_v32, %v560_v31  ;;  %v3934_v9 = vsel %vm3868_vm12, %v2867_v30, %v762_v33  ;;  %v766_v43 = vrot.slane %v493_v18, 5  ;;  %v403_v44 = vrot.slane %v401_v21, 7 }
  0x5e   : > { %v578_v45 = vor.u32 %v577_v38, %v574_v37  ;;  %v583_v46 = vrot.slane %v581_v29, 5  ;;  %v408_v50 = vshrl.u32 %v356_v34, 16  ;;  %v785_v58 = vunpack.c.l.b16 %v3934_v9 }
  0x5f   : > { %2861 = vmatmul.msk.bf16.gmra.mxu1 %vm642_vm10, %v3922_v19  ;;  %v565_v54 = vrot.slane %v564_v42, 4  ;;  %v3941_v56 = vsel %vm3868_vm12, %v2868_v39, %v766_v43  ;;  %v411_v62 = vshll.u32 %v356_v34, 16  ;;  %v406_v7 = vor.u32 %v404_v48, %v403_v44  ;;  %v3194_v44 = vld [vmem:[#allocation5 + $0x40] sm:$0xff] }
  0x60   : > { %v579_v1 = vrot.slane %v578_v45, 4  ;;  %v786_v20 = vunpack.c.l.b16 %v3941_v56  ;;  %v410_v13 = vrot.slane %v408_v50, 7  ;;  %v684_v21 = vpack.c.b16 %v3829_v52, %v3795_v6 }
  0x61   : > { %v570_v15 = vsel %vm3819_vm8, %v565_v54, %v569_v36  ;;  %v439_v24 = vsel %vm3783_vm2, 0, %v406_v7  ;;  %v746_v32 = vrot.slane %v3803_v11, 5  ;;  %v750_v33 = vrot.slane %v3843_v60, 5 }
  0x62   : > { %v584_v5 = vsel %vm3819_vm8, %v579_v1, %v583_v46  ;;  %v413_v16 = vor.u32 %v411_v62, %v410_v13  ;;  %v3949_v17 = vunpack.c.l.b16 %v570_v15  ;;  %v3961_v25 = vpack.c.b16 %v786_v20, %v785_v58  ;;  %v3201_v15 = vld [vmem:[#allocation5 + $0x78] sm:$0xff] }
  0x63   : > { %v3951_v18 = vunpack.c.l.b16 %v584_v5  ;;  %v451_v27 = vsel %vm3787_vm5, %v439_v24, 0  ;;  %v2863_v41 = vrot.slane %v3801_v10, 9  ;;  %v2864_v42 = vrot.slane %v3841_v59, 9  ;;  %v3197_v5 = vld [vmem:[#allocation5 + $0x58] sm:$0xff]  ;;  %1174 = vmatpush.bf16.msra.mxu3 %v3201_v15 }
  0x64   : > { %v440_v26 = vsel %vm3783_vm2, 0, %v413_v16  ;;  %v3969_v30 = vunpack.c.l.b16 %v451_v27  ;;  %v479_v31 = vunpack.c.h.b16 %v451_v27  ;;  %v3198_v27 = vld [vmem:[#allocation5 + $0x60] sm:$0xff]  ;;  %1058 = vmatpush.bf16.msrb.mxu1 %v3197_v5  ;;  %v949_v5 = vpack.c.b16 %v3903_v8, %v3882_v49 }
  0x65   : > { %v452_v29 = vsel %vm3787_vm5, %v440_v26, 0  ;;  %v3977_v37 = vpack.c.b16 %v3951_v18, %v3949_v17  ;;  %v747_v24 = vsel %vm3868_vm12, %v2863_v41, %v746_v32  ;;  %v751_v26 = vsel %vm3868_vm12, %v2864_v42, %v750_v33  ;;  %1117 = vmatpush.bf16.msrb.mxu2 %v3198_v27  ;;  %v3202_v49 = vld [vmem:[#allocation5 + $0x80] sm:$0xff] }
  0x66   : > { %v3973_v34 = vunpack.c.l.b16 %v452_v29  ;;  %v481_v36 = vunpack.c.h.b16 %v452_v29  ;;  %v494_v38 = vpack.c.b16 %v3969_v30, %v3969_v30  ;;  %v495_v39 = vpack.c.b16 %v479_v31, %v479_v31 }
  0x67   : > { %2859 = vmatmul.msk.bf16.vlgmr.msrb.gmra.mxu0 %vm642_vm10, %v684_v21  ;;  %v4002_v41 = vunpack.c.l.b16 %v747_v24  ;;  %v782_v33 = vunpack.c.l.b16 %v751_v26  ;;  %v861_v24 = vpack.c.b16 %v3845_v61, %v3829_v52  ;;  %v1025_v47 = vpack.c.b16 %v785_v58, %v784_v55  ;;  %v3200_v26 = vld [vmem:[#allocation5 + $0x70] sm:$0xff] }
  0x68   : > { %2881 = vmatmul.msk.bf16.gmra.mxu2 %vm642_vm10, %v3961_v25  ;;  %v496_v11 = vpack.c.b16 %v3973_v34, %v3973_v34  ;;  %v497_v60 = vpack.c.b16 %v481_v36, %v481_v36  ;;  %v3990_v43 = vpack.c.b16 %v3973_v34, %v3969_v30  ;;  %983 = vmatpush.bf16.msrb.mxu0 %v3195_v28  ;;  %v586_v45 = vshrl.u32 %v494_v38, 16 }
  0x69   : > { %v589_v46 = vshll.u32 %v494_v38, 16  ;;  %v595_v48 = vshll.u32 %v495_v39, 16  ;;  %v2869_v50 = vrot.slane %v494_v38, 9  ;;  %v770_v1 = vrot.slane %v495_v39, 5  ;;  %v3196_v38 = vld [vmem:[#allocation5 + $0x50] sm:$0xff]  ;;  %1175 = vmatpush.bf16.msra.mxu3 %v3200_v26 }
  0x6a   : > { %v600_v10 = vshrl.u32 %v496_v11, 16  ;;  %v603_v54 = vshll.u32 %v496_v11, 16  ;;  %v609_v62 = vshll.u32 %v497_v60, 16  ;;  %v588_v7 = vrot.slane %v586_v45, 4  ;;  %1059 = vmatpush.bf16.msrb.mxu1 %v3196_v38 }
  0x6b   : > { %2849 = vmatmul.msk.bf16.gmra.mxu3 %vm642_vm10, %v3977_v37  ;;  %v591_v13 = vrot.slane %v589_v46, 5  ;;  %v2870_v59 = vrot.slane %v496_v11, 9  ;;  %v597_v29 = vrot.slane %v595_v48, 5  ;;  %v771_v31 = vsel %vm3868_vm12, %v2869_v50, %v770_v1  ;;  %v3203_v1 = vld [vmem:[#allocation5 + $0x88] sm:$0xff] }
  0x6c   : > { %v602_v16 = vrot.slane %v600_v10, 4  ;;  %v605_v21 = vrot.slane %v603_v54, 5  ;;  %984 = vmatpush.bf16.msrb.mxu0 %v3194_v44  ;;  %v774_v36 = vrot.slane %v497_v60, 5  ;;  %v611_v11 = vrot.slane %v609_v62, 5 }
  0x6d   : > { %v592_v28 = vor.u32 %v591_v13, %v588_v7  ;;  %v787_v45 = vunpack.c.l.b16 %v771_v31  ;;  %v789_v54 = vpack.c.b16 %v782_v33, %v4002_v41  ;;  %v1024_v13 = vpack.c.b16 %v783_v53, %v782_v33 }
  0x6e   : > { %v606_v39 = vor.u32 %v605_v21, %v602_v16  ;;  %v4006_v42 = vsel %vm3868_vm12, %v2870_v59, %v774_v36  ;;  %v357_v59 = vld [vmem:[%s3769_s23 + $0x1c] sm:$0xf]  ;;  %v862_v55 = vpack.c.b16 %v3892_v57, %v3849_v0  ;;  %vm1708_vm7 = vcmask 523264   ;;  %s2721_s23 = sshll.u32 %s2718_s20, 4  ;;  %s2722_s23 = int_to_ptr.hbm [resolvable:$true] %s2721_s23 }
  0x6f   : > { %2862 = vmatmul.msk.bf16.gmra.mxu1 %vm642_vm10, %v3990_v43  ;;  %v593_v32 = vrot.slane %v592_v28, 4  ;;  %v788_v60 = vunpack.c.l.b16 %v4006_v42  ;;  %v415_v15 = vshrl.u32 %v357_v59, 16  ;;  %v418_v21 = vshll.u32 %v357_v59, 16  ;;  %s3534_s12 = sshra.s32 %s2722_s23, 4  ;;  %s3535_s12 = int_to_ptr.hbm [resolvable:$true] %s3534_s12 }
  0x70   : > { %v607_v44 = vrot.slane %v606_v39, 4  ;;  %v1026_v58 = vpack.c.b16 %v787_v45, %v786_v20  ;;  %v863_v20 = vpack.c.b16 %v3969_v30, %v3898_v4  ;;  %s3536_s19 = scalar_lea.hbm %s3535_s12, 64  ;;  %p3541_p11 = scmp.lt.s32.totalorder %s3535_s12, %s4786_s7 }
  0x71   : > { %v598_v46 = vsel %vm3819_vm8, %v593_v32, %v597_v29  ;;  %v4016_v62 = vpack.c.b16 %v788_v60, %v787_v45  ;;  %v417_v16 = vrot.slane %v415_v15, 7  ;;  %p3537_p1 = scmp.ne.s32.totalorder %s3535_s12, %s3536_s19  ;;  %p3542_p9 = scmp.lt.s32.totalorder %s3540_s14, %s3536_s19 }
  0x72   : > { %v612_v48 = vsel %vm3819_vm8, %v607_v44, %v611_v11  ;;  %v624_v50 = vunpack.c.l.b16 %v598_v46 }
  0x73   : > { %v4013_v10 = vunpack.c.l.b16 %v612_v48  ;;  %v420_v53 = vor.u32 %v418_v21, %v417_v16  ;;  %p3538_p4 = pnand %p3537_p1, %p3735_p3  ;;  %p3543_p2 = por %p3542_p9, %p3541_p11 }
  0x74   : > { %v951_v31 = vpack.c.b16 %v624_v50, %v3951_v18 }
  0x75   : > { %v4019_v7 = vpack.c.b16 %v4013_v10, %v624_v50  ;;  %v441_v52 = vsel %vm3783_vm2, 0, %v420_v53  ;;  %p3539_p8 = pneg %p3538_p4 }
  0x76   : > { %v453_v61 = vsel %vm3787_vm5, %v441_v52, 0 }
  0x77   : > { %2879 = vmatmul.msk.bf16.vlgmr.msra.gmra.mxu0 %vm642_vm10, %v789_v54  ;;  %v860_v51 = vunpack.c.l.b16 %v453_v61  ;;  %v926_v9 = vunpack.c.h.b16 %v453_v61  ;;  %p3544_p10 = pnand %p3543_p2, %p3539_p8 }
  0x78   : > { %2882 = vmatmul.msk.bf16.gmra.mxu2 %vm642_vm10, %v4016_v62  ;;  %1232 = vmatpush.bf16.msra.mxu0 %v3203_v1 }
  0x79   : > { %v927_v8 = vpack.c.b16 %v860_v51, %v860_v51  ;;  %v928_v29 = vpack.c.b16 %v926_v9, %v926_v9  ;;  %v1094_v4 = vpack.c.b16 %v3795_v6, %v860_v51  ;;  %v864_v30 = vpack.c.b16 %v860_v51, %v3973_v34 }
  0x7b   : > { %2850 = vmatmul.msk.bf16.gmra.mxu3 %vm642_vm10, %v4019_v7  ;;  %v930_v27 = vshrl.u32 %v927_v8, 16  ;;  %v933_v28 = vshll.u32 %v927_v8, 16  ;;  %v939_v38 = vshll.u32 %v928_v29, 16 }
  0x7c   : > { %1233 = vmatpush.bf16.msra.mxu0 %v3202_v49 }
  0x7d   : > { %v932_v0 = vrot.slane %v930_v27, 4  ;;  %v935_v57 = vrot.slane %v933_v28, 5  ;;  %v941_v11 = vrot.slane %v939_v38, 5 }
  0x7f   : > { %2916 = vmatmul.msk.bf16.vlgmr.msrb.gmra.mxu1 %vm642_vm10, %v1024_v13  ;;  %v936_v36 = vor.u32 %v935_v57, %v932_v0 }
  0x81   : > { %v937_v39 = vrot.slane %v936_v36, 4 }
  0x83   : > { %v942_v18 = vsel %vm3819_vm8, %v937_v39, %v941_v11 }
  0x84   : > { %v948_v33 = vunpack.c.l.b16 %v942_v18 }
  0x86   : > { %v952_v42 = vpack.c.b16 %v948_v33, %v4013_v10 }
  0x87   : > { %2903 = vmatmul.msk.bf16.vlgmr.msrb.gmra.mxu0 %vm642_vm10, %v949_v5 }
  0x88   : > { %2928 = vmatmul.msk.bf16.vlgmr.msrb.gmra.mxu2 %vm642_vm10, %v3862_v22  ;;  %v950_v22 = vpack.c.b16 %v3949_v17, %v3912_v14  ;;  %v2907_v14 = vrot.slane %v927_v8, 9  ;;  %v1016_v17 = vrot.slane %v928_v29, 5 }
  0x8b   : > { %2891 = vmatmul.msk.bf16.vlgmr.msrb.gmra.mxu3 %vm642_vm10, %v861_v24 }
  0x8f   : > { %2917 = vmatmul.msk.bf16.gmra.mxu1 %vm642_vm10, %v1025_v47 }
  0x97   : > { %2904 = vmatmul.msk.bf16.gmra.mxu0 %vm642_vm10, %v950_v22 }
  0x98   : > { %2929 = vmatmul.msk.bf16.gmra.mxu2 %vm642_vm10, %v3922_v19  ;;  %v1017_v19 = vsel %vm3868_vm12, %v2907_v14, %v1016_v17 }
  0x99   : > { %v1023_v56 = vunpack.c.l.b16 %v1017_v19 }
  0x9b   : > { %2892 = vmatmul.msk.bf16.gmra.mxu3 %vm642_vm10, %v862_v55  ;;  %v1027_v32 = vpack.c.b16 %v1023_v56, %v788_v60  ;;  %v1210_v15 = vpack.c.b16 %v4002_v41, %v1023_v56 }
  0x9f   : > { %2918 = vmatmul.msk.bf16.gmra.mxu1 %vm642_vm10, %v1026_v58 }
  0xa7   : > { %2905 = vmatmul.msk.bf16.gmra.mxu0 %vm642_vm10, %v951_v31 }
  0xa8   : > { %2930 = vmatmul.msk.bf16.gmra.mxu2 %vm642_vm10, %v3990_v43 }
  0xab   : > { %2893 = vmatmul.msk.bf16.gmra.mxu3 %vm642_vm10, %v863_v20 }
  0xaf   : > { %2919 = vmatmul.msk.bf16.gmra.mxu1 %vm642_vm10, %v1027_v32 }
  0xb7   : > { %2906 = vmatmul.msk.bf16.gmra.mxu0 %vm642_vm10, %v952_v42 }
  0xb8   : > { %2931 = vmatmul.msk.bf16.gmra.mxu2 %vm642_vm10, %v1094_v4 }
  0xbb   : > { %2894 = vmatmul.msk.bf16.gmra.mxu3 %vm642_vm10, %v864_v30 }
  0xc7   : > { %2952 = vmatmul.msk.bf16.vlgmr.msra.gmra.mxu0 %vm642_vm10, %v3909_v12 }
  0xcb   : > { %2940 = vmatmul.msk.bf16.vlgmr.msra.gmra.mxu3 %vm642_vm10, %v3926_v23 }
  0xcc   : > { %v4080_v44 = vpop.f32.mrf.mxu1 }
  0xd4   : > { %v664_v43 = vpop.f32.mrf.mxu0  ;;  %v4090_v46 = vpop.f32.mrf.mxu1 }
  0xd7   : > { %2953 = vmatmul.msk.bf16.gmra.mxu0 %vm642_vm10, %v3961_v25 }
  0xdb   : > { %2941 = vmatmul.msk.bf16.gmra.mxu3 %vm642_vm10, %v3977_v37  ;;  %v4086_v34 = vpop.f32.mrf.mxu2 }
  0xdc   : > { %v666_v45 = vpop.f32.mrf.mxu0  ;;  %v731_v25 = vpop.f32.mrf.mxu1 }
  0xde   : > { %v4088_v60 = vpop.f32.mrf.mxu3 }
  0xe3   : > { %v4092_v12 = vpop.f32.mrf.mxu2 }
  0xe4   : > { %v721_v48 = vpop.f32.mrf.mxu0  ;;  %v4100_v59 = vpop.f32.mrf.mxu1 }
  0xe5   : > { %v722_v23 = vadd.f32 %v721_v48, %v664_v43 }
  0xe6   : > { %v4094_v50 = vpop.f32.mrf.mxu3 }
  0xe7   : > { %2954 = vmatmul.msk.bf16.gmra.mxu0 %vm642_vm10, %v4016_v62  ;;  %v1152_v62 = vpack.c.b16 %v3847_v63, %v948_v33 }
  0xeb   : > { %2942 = vmatmul.msk.bf16.gmra.mxu3 %vm642_vm10, %v4019_v7  ;;  %v836_v37 = vpop.f32.mrf.mxu2 }
  0xec   : > { %v723_v10 = vpop.f32.mrf.mxu0  ;;  %v736_v7 = vpop.f32.mrf.mxu1 }
  0xee   : > { %v674_v54 = vpop.f32.mrf.mxu3 }
  0xef   : > { %v732_v1 = vadd.f32 %v731_v25, %v674_v54 }
  0xf1   : > { %v850_v13 = vadd.f32 %v836_v37, %v732_v1 }
  0xf3   : > { %v4103_v16 = vpop.f32.mrf.mxu2 }
  0xf4   : > { %v826_v5 = vpop.f32.mrf.mxu0  ;;  %v4114_v28 = vpop.f32.mrf.mxu1 }
  0xf5   : > { %v846_v21 = vadd.f32 %v826_v5, %v722_v23  ;;  %v724_v23 = vadd.f32 %v723_v10, %v666_v45  ;;  %v727_v5 = vadd.f32 %v4080_v44, %v4088_v60  ;;  %v4136_v45 = vld [vmem:[%s4781_s2] ss:$0 sm:$0xff] }
  0xf6   : > { %v4105_v24 = vpop.f32.mrf.mxu3 }
  0xf7   : > { %2955 = vmatmul.msk.bf16.gmra.mxu0 %vm642_vm10, %v1210_v15 }
  0xfb   : > { %2943 = vmatmul.msk.bf16.gmra.mxu3 %vm642_vm10, %v1152_v62  ;;  %v841_v26 = vpop.f32.mrf.mxu2 }
  0xfc   : > { %v828_v47 = vpop.f32.mrf.mxu0  ;;  %v1061_v0 = vpop.f32.mrf.mxu1 }
  0xfd   : > { %v847_v54 = vadd.f32 %v828_v47, %v724_v23 }
  0xfe   : > { %v679_v53 = vpop.f32.mrf.mxu3 }
  0xff   : > { %v737_v49 = vadd.f32 %v736_v7, %v679_v53 }
 0x101   : > { %v852_v52 = vadd.f32 %v841_v26, %v737_v49  ;;  %v848_v49 = vadd.f32 %v4086_v34, %v727_v5 }
 0x103   : > { %v4116_v17 = vpop.f32.mrf.mxu2 }
 0x104   : > { %v986_v61 = vpop.f32.mrf.mxu0  ;;  %v1063_v20 = vpop.f32.mrf.mxu1 }
 0x106   : > { %v4110_v22 = vpop.f32.mrf.mxu3 }
 0x10b   : > { %v1119_v19 = vpop.f32.mrf.mxu2 }
 0x10c   : > { %v988_v51 = vpop.f32.mrf.mxu0  ;;  %v1066_v33 = vpop.f32.mrf.mxu1 }
 0x10e   : > { %v898_v55 = vpop.f32.mrf.mxu3 }
 0x10f   : > { %v918_v4 = vadd.f32 %v898_v55, %v846_v21  ;;  %v729_v55 = vadd.f32 %v4090_v46, %v4094_v50 }
 0x111   : > { %v1006_v25 = vadd.f32 %v986_v61, %v918_v4 }
 0x113   : > { %v1121_v11 = vpop.f32.mrf.mxu2  ;;  %v1081_v1 = vadd.f32 %v1061_v0, %v1006_v25  ;;  %v849_v0 = vadd.f32 %v4092_v12, %v729_v55  ;;  %v3211_v12 = vld [vmem:[#allocation7 + $0x38] sm:$0xff]  ;;  %v739_v55 = vadd.f32 %v4114_v28, %v4110_v22 }
 0x114   : > { %v991_v8 = vpop.f32.mrf.mxu0  ;;  %v1068_v15 = vpop.f32.mrf.mxu1  ;;  %1725 = vmatpush.bf16.msra.mxu1 %v3211_v12 }
 0x115   : > { %v1139_v62 = vadd.f32 %v1119_v19, %v1081_v1  ;;  %v3219_v1 = vld [vmem:[#allocation7 + $0x78] sm:$0xff]  ;;  %v853_v22 = vadd.f32 %v4116_v17, %v739_v55  ;;  %v3209_v17 = vld [vmem:[#allocation7 + $0x28] sm:$0xff] }
 0x116   : > { %v900_v9 = vpop.f32.mrf.mxu3  ;;  %1995 = vmatpush.bf16.msrb.mxu0 %v3219_v1 }
 0x11b   : > { %v1124_v43 = vpop.f32.mrf.mxu2 }
 0x11c   : > { %v4112_v58 = vpop.f32.mrf.mxu0  ;;  %v4140_v44 = vpop.f32.mrf.mxu1 }
 0x11e   : > { %v903_v27 = vpop.f32.mrf.mxu3 }
 0x11f   : > { %v920_v47 = vadd.f32 %v903_v27, %v848_v49  ;;  %v3204_v49 = vld [vmem:[#allocation7] sm:$0xff] }
 0x123   : > { %v1126_v53 = vpop.f32.mrf.mxu2 }
 0x124   : > { %v996_v29 = vpop.f32.mrf.mxu0  ;;  %v4153_v4 = vpop.f32.mrf.mxu1 }
 0x126   : > { %v905_v14 = vpop.f32.mrf.mxu3 }
 0x127   : > { %v921_v46 = vadd.f32 %v905_v14, %v849_v0  ;;  %v3215_v14 = vld [vmem:[#allocation7 + $0x58] sm:$0xff] }
 0x128   : > { %1907 = vmatpush.bf16.msrb.mxu3 %v3215_v14 }
 0x12c   : > { %v4118_v57 = vpop.f32.mrf.mxu0 }
 0x12e   : > { %v908_v31 = vpop.f32.mrf.mxu3 }
 0x12f   : > { %v922_v36 = vadd.f32 %v908_v31, %v850_v13  ;;  %v919_v13 = vadd.f32 %v900_v9, %v847_v54  ;;  %v1008_v9 = vadd.f32 %v991_v8, %v920_v47  ;;  %v4147_v31 = vpop.f32.mrf.mxu2  ;;  %v3205_v54 = vld [vmem:[#allocation7 + $0x8] sm:$0xff] }
 0x131   : > { %v4120_v38 = vadd.f32 %v996_v29, %v922_v36  ;;  %v1007_v7 = vadd.f32 %v988_v51, %v919_v13  ;;  %v3207_v36 = vld [vmem:[#allocation7 + $0x18] sm:$0xff] }
 0x132   : > { %1794 = vmatpush.bf16.msra.mxu2 %v3207_v36 }
 0x133   : > { %v1082_v10 = vadd.f32 %v1063_v20, %v1007_v7  ;;  %v3214_v7 = vld [vmem:[#allocation7 + $0x50] sm:$0xff]  ;;  %v1085_v28 = vadd.f32 %v4140_v44, %v4120_v38 }
 0x134   : > { %v1001_v56 = vpop.f32.mrf.mxu0  ;;  %1908 = vmatpush.bf16.msrb.mxu3 %v3214_v7 }
 0x135   : > { %v1140_v51 = vadd.f32 %v1121_v11, %v1082_v10  ;;  %v3206_v11 = vld [vmem:[#allocation7 + $0x10] sm:$0xff]  ;;  %v1143_v14 = vadd.f32 %v4147_v31, %v1085_v28 }
 0x136   : > { %v4122_v39 = vpop.f32.mrf.mxu3  ;;  %1795 = vmatpush.bf16.msra.mxu2 %v3206_v11 }
 0x13a   : > { %1796 = vmatpush.bf16.msra.mxu2 %v3205_v54 }
 0x13c   : > { %v4124_v32 = vpop.f32.mrf.mxu0 }
 0x13e   : > { %v913_v18 = vpop.f32.mrf.mxu3  ;;  %1797 = vmatpush.bf16.msra.mxu2 %v3204_v49 }
 0x13f   : > { %v924_v42 = vadd.f32 %v913_v18, %v852_v52 }
 0x141   : > { %v4126_v30 = vadd.f32 %v1001_v56, %v924_v42  ;;  %v1083_v56 = vadd.f32 %v1066_v33, %v1008_v9  ;;  %v1009_v42 = vadd.f32 %v4112_v58, %v921_v46  ;;  %v4159_v58 = vpop.f32.mrf.mxu2 }
 0x143   : > { %v1141_v18 = vadd.f32 %v1124_v43, %v1083_v56  ;;  %v1084_v43 = vadd.f32 %v1068_v15, %v1009_v42  ;;  %v3212_v56 = vld [vmem:[#allocation7 + $0x40] sm:$0xff] }
 0x144   : > { %v1235_v48 = vpop.f32.mrf.mxu0 }
 0x145   : > { %v1142_v15 = vadd.f32 %v1126_v53, %v1084_v43  ;;  %v3217_v53 = vld [vmem:[#allocation7 + $0x68] sm:$0xff] }
 0x146   : > { %v4128_v37 = vpop.f32.mrf.mxu3 }
 0x147   : > { %v925_v42 = vadd.f32 %v4128_v37, %v853_v22 }
 0x149   : > { %v4179_v46 = vpop.f32.mrf.mxu2 }
 0x14c   : > { %v1237_v26 = vpop.f32.mrf.mxu0 }
 0x14e   : > { %v1177_v21 = vpop.f32.mrf.mxu3 }
 0x14f   : > { %v1197_v52 = vadd.f32 %v1177_v21, %v1139_v62  ;;  %v3210_v62 = vld [vmem:[#allocation7 + $0x30] sm:$0xff] }
 0x150   : > { %1726 = vmatpush.bf16.msra.mxu1 %v3210_v62 }
 0x151   : > { %v1255_v61 = vadd.f32 %v1235_v48, %v1197_v52  ;;  %v3218_v52 = vld [vmem:[#allocation7 + $0x70] sm:$0xff] }
 0x152   : > { %1996 = vmatpush.bf16.msrb.mxu0 %v3218_v52 }
 0x153   : > { %v4143_v60 = vadd.f32 %v4136_v45, %v1255_v61 }
 0x154   : > { %v1240_v19 = vpop.f32.mrf.mxu0  ;;  %1727 = vmatpush.bf16.msra.mxu1 %v3209_v17 }
 0x155   : > { %v2956_v34 = vmul.f32 -1.442695, %v4143_v60 }
 0x156   : > { %v1179_v29 = vpop.f32.mrf.mxu3  ;;  %1997 = vmatpush.bf16.msrb.mxu0 %v3217_v53 }
 0x157   : > { %3336 = vpow2.f32 %v2956_v34  ;;  %v1198_v27 = vadd.f32 %v1179_v29, %v1140_v51  ;;  %v1076_v34 = vpop.f32.mrf.mxu1 }
 0x159   : > { %v1256_v50 = vadd.f32 %v1237_v26, %v1198_v27  ;;  %v734_v26 = vadd.f32 %v4100_v59, %v4105_v24  ;;  %v3213_v24 = vld [vmem:[#allocation7 + $0x48] sm:$0xff] }
 0x15a   : > { %1909 = vmatpush.bf16.msrb.mxu3 %v3213_v24 }
 0x15b   : > { %v4150_v20 = vadd.f32 %v4136_v45, %v1256_v50  ;;  %v851_v9 = vadd.f32 %v4103_v16, %v734_v26 }
 0x15c   : > { %v1242_v5 = vpop.f32.mrf.mxu0 }
 0x15d   : > { %v3337_v8 = vpop.eup %3336  ;;  %v2957_v48 = vmul.f32 -1.442695, %v4150_v20  ;;  %v923_v27 = vadd.f32 %v4122_v39, %v851_v9 }
 0x15e   : > { %v4156_v23 = vadd.f32 1.0, %v3337_v8  ;;  %v1182_v33 = vpop.f32.mrf.mxu3  ;;  %1910 = vmatpush.bf16.msrb.mxu3 %v3212_v56 }
 0x15f   : > { %3338 = vpow2.f32 %v2957_v48  ;;  %v1199_v25 = vadd.f32 %v1182_v33, %v1141_v18  ;;  %v3216_v18 = vld [vmem:[#allocation7 + $0x60] sm:$0xff]  ;;  %v1011_v38 = vadd.f32 %v4118_v57, %v923_v27 }
 0x160   : > { %3340 = vrcp.f32 %v4156_v23  ;;  %v1318_v16 = vand.u32 2147483648, %v4156_v23  ;;  %v1316_v11 = vand.u32 2147483647, %v4156_v23  ;;  %vm1312_vm14 = vweird.f32 %v4156_v23  ;;  %1998 = vmatpush.bf16.msrb.mxu0 %v3216_v18 }
 0x161   : > { %v1257_v13 = vadd.f32 %v1240_v19, %v1199_v25  ;;  %v1086_v31 = vadd.f32 %v4153_v4, %v1011_v38 }
 0x162   : > { %v1319_v25 = vor.u32 1.1754944e-38, %v1318_v16  ;;  %vm1317_vm0 = vcmp.eq.f32.partialorder %v1316_v11, 8.507059e+37 }
 0x163   : > { %v4164_v21 = vadd.f32 %v4136_v45, %v1257_v13  ;;  %v3208_v13 = vld [vmem:[#allocation7 + $0x20] sm:$0xff]  ;;  %v1144_v4 = vadd.f32 %v4159_v58, %v1086_v31 }
 0x164   : > { %v1245_v39 = vpop.f32.mrf.mxu0  ;;  %1728 = vmatpush.bf16.msra.mxu1 %v3208_v13 }
 0x165   : > { %v3339_v10 = vpop.eup %3338  ;;  %v2958_v47 = vmul.f32 -1.442695, %v4164_v21 }
 0x166   : > { %v3341_v61 = vpop.eup %3340  ;;  %v4169_v51 = vadd.f32 1.0, %v3339_v10  ;;  %v1184_v59 = vpop.f32.mrf.mxu3 }
 0x167   : > { %v1308_v29 = vmul.f32 %v3341_v61, %v4156_v23  ;;  %3342 = vpow2.f32 %v2958_v47  ;;  %v1200_v0 = vadd.f32 %v1184_v59, %v1142_v15  ;;  %vm1313_vm13 = vweird.f32 %v3341_v61  ;;  %v1136_v59 = vpop.f32.mrf.mxu2 }
 0x168   : > { %3344 = vrcp.f32 %v4169_v51  ;;  %vm1314_vm15 = vmor %vm1312_vm14, %vm1313_vm13  ;;  %v1013_v23 = vadd.f32 %v4124_v32, %v925_v42  ;;  %v1331_v49 = vand.u32 2147483647, %v4169_v51  ;;  %v1333_v52 = vand.u32 2147483648, %v4169_v51 }
 0x169   : > { %v1309_v19 = vsub.f32 1.0, %v1308_v29  ;;  %v1258_v36 = vadd.f32 %v1242_v5, %v1200_v0  ;;  %v1078_v5 = vpop.f32.mrf.mxu1  ;;  %v1087_v47 = vadd.f32 %v1076_v34, %v4126_v30  ;;  %vm1327_vm3 = vweird.f32 %v4169_v51 }
 0x16a   : > { %vm1332_vm6 = vcmp.eq.f32.partialorder %v1331_v49, 8.507059e+37  ;;  %v1334_v0 = vor.u32 1.1754944e-38, %v1333_v52 }
 0x16b   : > { %v1310_v50 = vmul.f32 %v3341_v61, %v1309_v19  ;;  %v4183_v8 = vadd.f32 %v4136_v45, %v1258_v36  ;;  %v1145_v22 = vadd.f32 %v4179_v46, %v1087_v47 }
 0x16c   : > { %v1247_v9 = vpop.f32.mrf.mxu0 }
 0x16d   : > { %v3343_v12 = vpop.eup %3342  ;;  %v1311_v44 = vadd.f32 %v3341_v61, %v1310_v50  ;;  %v2959_v48 = vmul.f32 -1.442695, %v4183_v8 }
 0x16e   : > { %v3345_v33 = vpop.eup %3344  ;;  %v4191_v54 = vadd.f32 1.0, %v3343_v12  ;;  %v1187_v37 = vpop.f32.mrf.mxu3 }
 0x16f   : > { %v1315_v1 = vsel %vm1314_vm15, %v3341_v61, %v1311_v44  ;;  %v1323_v57 = vmul.f32 %v3345_v33, %v4169_v51  ;;  %3346 = vpow2.f32 %v2959_v48  ;;  %v1201_v26 = vadd.f32 %v1187_v37, %v1143_v14 }
 0x170   : > { %v1320_v43 = vsel %vm1317_vm0, %v1319_v25, %v1315_v1  ;;  %3348 = vrcp.f32 %v4191_v54  ;;  %vm1328_vm1 = vweird.f32 %v3345_v33  ;;  %v1088_v61 = vadd.f32 %v1078_v5, %v1013_v23 }
 0x171   : > { %v1427_v62 = vmul.f32 %v1320_v43, %v4143_v60  ;;  %v1324_v7 = vsub.f32 1.0, %v1323_v57  ;;  %v1259_v32 = vadd.f32 %v1245_v39, %v1201_v26  ;;  %vm1329_vm4 = vmor %vm1327_vm3, %vm1328_vm1  ;;  %v1346_v11 = vand.u32 2147483647, %v4191_v54 }
 0x172   : > { %v4210_v28 = vadd.f32 %v1136_v59, %v1088_v61  ;;  %v1348_v39 = vand.u32 2147483648, %v4191_v54  ;;  %vm1342_vm9 = vweird.f32 %v4191_v54 }
 0x173   : > { %v1435_v10 = vpack.c.bf16 %v1427_v62, %v1427_v62  ;;  %v1325_v15 = vmul.f32 %v3345_v33, %v1324_v7  ;;  %v4206_v27 = vadd.f32 %v4136_v45, %v1259_v32  ;;  %vm4224_vm11 = vcmp.eq.f32.partialorder %v1346_v11, 8.507059e+37 }
 0x174   : > { %v1349_v1 = vor.u32 1.1754944e-38, %v1348_v39  ;;  %v1250_v62 = vpop.f32.mrf.mxu0 }
 0x175   : > { %v3347_v55 = vpop.eup %3346  ;;  %v1444_v24 = vshrl.u32 %v1435_v10, 16  ;;  %v1326_v60 = vadd.f32 %v3345_v33, %v1325_v15  ;;  %v1447_v19 = vshll.u32 %v1435_v10, 16  ;;  %v2960_v18 = vmul.f32 -1.442695, %v4206_v27 }
 0x176   : > { %v3349_v29 = vpop.eup %3348  ;;  %v4203_v53 = vadd.f32 1.0, %v3347_v55  ;;  %v1189_v30 = vpop.f32.mrf.mxu3 }
 0x177   : > { %v1446_v34 = vrot.slane %v1444_v24, 7  ;;  %v1330_v36 = vsel %vm1329_vm4, %v3345_v33, %v1326_v60  ;;  %v1338_v58 = vmul.f32 %v3349_v29, %v4191_v54  ;;  %v1202_v42 = vadd.f32 %v1189_v30, %v1144_v4 }
 0x178   : > { %v1335_v51 = vsel %vm1332_vm6, %v1334_v0, %v1330_v36  ;;  %3350 = vrcp.f32 %v4203_v53  ;;  %vm1343_vm10 = vweird.f32 %v3349_v29  ;;  %vm1357_vm13 = vweird.f32 %v4203_v53 }
 0x179   : > { %v1449_v16 = vor.u32 %v1447_v19, %v1446_v34  ;;  %v1428_v56 = vmul.f32 %v1335_v51, %v4150_v20  ;;  %v1339_v50 = vsub.f32 1.0, %v1338_v58  ;;  %3352 = vpow2.f32 %v2960_v18  ;;  %vm1344_vm14 = vmor %vm1342_vm9, %vm1343_vm10 }
 0x17a   : > { %v1260_v20 = vadd.f32 %v1247_v9, %v1202_v42  ;;  %v1361_v5 = vand.u32 2147483647, %v4203_v53  ;;  %v1363_v26 = vand.u32 2147483648, %v4203_v53 }
 0x17b   : > { %v1507_v46 = vsel %vm3783_vm2, 0, %v1449_v16  ;;  %v1436_v17 = vpack.c.bf16 %v1428_v56, %v1428_v56  ;;  %v1340_v12 = vmul.f32 %v3349_v29, %v1339_v50 }
 0x17c   : > { %v1515_v38 = vsel %vm3787_vm5, %v1507_v46, 0  ;;  %v4230_v57 = vadd.f32 %v4136_v45, %v1260_v20  ;;  %vm4257_vm0 = vcmp.eq.f32.partialorder %v1361_v5, 8.507059e+37  ;;  %v1364_v19 = vor.u32 1.1754944e-38, %v1363_v26 }
 0x17d   : > { %v4222_v44 = vunpack.c.l.b16 %v1515_v38  ;;  %v1539_v48 = vunpack.c.h.b16 %v1515_v38  ;;  %v1451_v33 = vshrl.u32 %v1436_v17, 16  ;;  %v1341_v37 = vadd.f32 %v3349_v29, %v1340_v12 }
 0x17e   : > { %v3351_v25 = vpop.eup %3350  ;;  %v1192_v23 = vpop.f32.mrf.mxu3  ;;  %v1454_v13 = vshll.u32 %v1436_v17, 16  ;;  %v2961_v49 = vmul.f32 -1.442695, %v4230_v57 }
 0x17f   : > { %v1453_v43 = vrot.slane %v1451_v33, 7  ;;  %v1353_v31 = vmul.f32 %v3351_v25, %v4203_v53  ;;  %v1345_v7 = vsel %vm1344_vm14, %v3349_v29, %v1341_v37  ;;  %v1203_v52 = vadd.f32 %v1192_v23, %v1145_v22  ;;  %v3353_v47 = vpop.eup %3352  ;;  %v1252_v53 = vpop.f32.mrf.mxu0 }
 0x180   : > { %v4241_v10 = vpack.c.b16 %v4222_v44, %v4222_v44  ;;  %v1553_v15 = vpack.c.b16 %v1539_v48, %v1539_v48  ;;  %v1350_v54 = vsel %vm4224_vm11, %v1349_v1, %v1345_v7  ;;  %3354 = vpow2.f32 %v2961_v49 }
 0x181   : > { %v1456_v32 = vor.u32 %v1454_v13, %v1453_v43  ;;  %v1429_v61 = vmul.f32 %v1350_v54, %v4164_v21  ;;  %v1354_v55 = vsub.f32 1.0, %v1353_v31  ;;  %v1261_v4 = vadd.f32 %v1250_v62, %v1203_v52 }
 0x182   : > { %vm1358_vm15 = vweird.f32 %v3351_v25  ;;  %v4248_v24 = vadd.f32 1.0, %v3353_v47  ;;  %v1750_v60 = vpack.c.b16 %v4222_v44, %v3795_v6  ;;  %v1576_v21 = vshll.u32 %v1553_v15, 16 }
 0x183   : > { %v1508_v59 = vsel %vm3783_vm2, 0, %v1456_v32  ;;  %v1437_v29 = vpack.c.bf16 %v1429_v61, %v1429_v61  ;;  %v1355_v0 = vmul.f32 %v3351_v25, %v1354_v55  ;;  %v4255_v30 = vadd.f32 %v4136_v45, %v1261_v4  ;;  %vm1359_vm1 = vmor %vm1357_vm13, %vm1358_vm15 }
 0x184   : > { %v1516_v9 = vsel %vm3787_vm5, %v1508_v59, 0  ;;  %3356 = vrcp.f32 %v4248_v24  ;;  %3000 = vmatmul.msk.bf16.vlgmr.msra.gmra.mxu2 %vm1708_vm7, %v1750_v60  ;;  %v1821_v36 = vrot.slane %v1553_v15, 5  ;;  %v1376_v17 = vand.u32 2147483647, %v4248_v24 }
 0x185   : > { %v4263_v58 = vunpack.c.l.b16 %v1516_v9  ;;  %v1458_v22 = vshrl.u32 %v1437_v29, 16  ;;  %v1356_v51 = vadd.f32 %v3351_v25, %v1355_v0  ;;  %v1541_v56 = vunpack.c.h.b16 %v1516_v9 }
 0x186   : > { %v1194_v16 = vpop.f32.mrf.mxu3  ;;  %v1461_v50 = vshll.u32 %v1437_v29, 16  ;;  %v2962_v11 = vmul.f32 -1.442695, %v4255_v30  ;;  %v3355_v18 = vpop.eup %3354  ;;  %v3004_v12 = vrot.slane %v4241_v10, 9  ;;  %v1378_v20 = vand.u32 2147483648, %v4248_v24 }
 0x187   : > { %v1204_v39 = vadd.f32 %v1194_v16, %v4210_v28  ;;  %v1460_v42 = vrot.slane %v1458_v22, 7  ;;  %v1360_v46 = vsel %vm1359_vm1, %v3351_v25, %v1356_v51  ;;  %v4275_v48 = vadd.f32 1.0, %v3355_v18 }
 0x188   : > { %v1365_v38 = vsel %vm4257_vm0, %v1364_v19, %v1360_v46  ;;  %3358 = vpow2.f32 %v2962_v11  ;;  %v4280_v28 = vsel %vm3868_vm12, %v3004_v12, %v1821_v36  ;;  %v4282_v37 = vrot.slane %v1576_v21, 5 }
 0x189   : > { %v1430_v33 = vmul.f32 %v1365_v38, %v4183_v8  ;;  %v1262_v14 = vadd.f32 %v1252_v53, %v1204_v39  ;;  %v1463_v1 = vor.u32 %v1461_v50, %v1460_v42  ;;  %vm1372_vm3 = vweird.f32 %v4248_v24  ;;  %v3223_v50 = vld [vmem:[#allocation7 + $0x98] sm:$0xff]  ;;  %v3222_v38 = vld [vmem:[#allocation7 + $0x90] sm:$0xff] }
 0x18a   : > { %v3357_v25 = vpop.eup %3356  ;;  %3360 = vrcp.f32 %v4275_v48  ;;  %v4286_v23 = vpack.c.b16 %v1541_v56, %v1541_v56  ;;  %vm4292_vm4 = vcmp.eq.f32.partialorder %v1376_v17, 8.507059e+37  ;;  %v1379_v5 = vor.u32 1.1754944e-38, %v1378_v20  ;;  %2099 = vmatpush.bf16.msrb.mxu1 %v3223_v50 }
 0x18b   : > { %v1438_v43 = vpack.c.bf16 %v1430_v33, %v1430_v33  ;;  %v1368_v13 = vmul.f32 %v3357_v25, %v4248_v24  ;;  %v4290_v8 = vadd.f32 %v4136_v45, %v1262_v14  ;;  %v1856_v62 = vunpack.c.l.b16 %v4280_v28 }
 0x18c   : > { %v1951_v7 = vpack.c.b16 %v4263_v58, %v4222_v44  ;;  %vm1373_vm6 = vweird.f32 %v3357_v25  ;;  %v1567_v32 = vshrl.u32 %v4241_v10, 16  ;;  %v1570_v54 = vshll.u32 %v4241_v10, 16 }
 0x18d   : > { %v1465_v26 = vshrl.u32 %v1438_v43, 16  ;;  %v1369_v49 = vsub.f32 1.0, %v1368_v13  ;;  %v2963_v52 = vmul.f32 -1.442695, %v4290_v8  ;;  %v1863_v45 = vpack.c.b16 %v1856_v62, %v4002_v41  ;;  %vm1374_vm10 = vmor %vm1372_vm3, %vm1373_vm6 }
 0x18e   : > { %v3359_v15 = vpop.eup %3358  ;;  %3047 = vmatmul.msk.bf16.vlgmr.msrb.gmra.mxu0 %vm1708_vm7, %v1951_v7  ;;  %v1509_v47 = vsel %vm3783_vm2, 0, %v1463_v1  ;;  %v1468_v59 = vshll.u32 %v1438_v43, 16  ;;  %vm1387_vm9 = vweird.f32 %v4275_v48  ;;  %v1569_v60 = vrot.slane %v1567_v32, 4  ;;  %2100 = vmatpush.bf16.msrb.mxu1 %v3222_v38 }
 0x18f   : > { %v1467_v44 = vrot.slane %v1465_v26, 7  ;;  %v1370_v61 = vmul.f32 %v3357_v25, %v1369_v49  ;;  %v4308_v55 = vadd.f32 1.0, %v3359_v15  ;;  %3362 = vpow2.f32 %v2963_v52  ;;  %3027 = vmatmul.msk.bf16.vlgmr.msrb.gmra.mxu3 %vm1708_vm7, %v1863_v45 }
 0x190   : > { %v3361_v4 = vpop.eup %3360  ;;  %v1572_v9 = vrot.slane %v1570_v54, 5  ;;  %v1391_v10 = vand.u32 2147483647, %v4275_v48  ;;  %v1517_v21 = vsel %vm3787_vm5, %v1509_v47, 0  ;;  %v1393_v19 = vand.u32 2147483648, %v4275_v48 }
 0x191   : > { %v1371_v29 = vadd.f32 %v3357_v25, %v1370_v61  ;;  %v1383_v0 = vmul.f32 %v3361_v4, %v4275_v48  ;;  %v1470_v34 = vor.u32 %v1468_v59, %v1467_v44  ;;  %3364 = vrcp.f32 %v4308_v55 }
 0x192   : > { %v4323_v36 = vpack.c.b16 %v4263_v58, %v4263_v58  ;;  %v1408_v16 = vand.u32 2147483648, %v4308_v55  ;;  %v1573_v56 = vor.u32 %v1572_v9, %v1569_v60  ;;  %vm1388_vm11 = vweird.f32 %v3361_v4 }
 0x193   : > { %v1375_v22 = vsel %vm1374_vm10, %v3357_v25, %v1371_v29  ;;  %v1384_v51 = vsub.f32 1.0, %v1383_v0  ;;  %v1406_v24 = vand.u32 2147483647, %v4308_v55  ;;  %v4329_v39 = vunpack.c.l.b16 %v1517_v21  ;;  %vm1389_vm15 = vmor %vm1387_vm9, %vm1388_vm11 }
 0x194   : > { %v1380_v11 = vsel %vm4292_vm4, %v1379_v5, %v1375_v22  ;;  %v1574_v17 = vrot.slane %v1573_v56, 4  ;;  %v1543_v12 = vunpack.c.h.b16 %v1517_v21  ;;  %vm4332_vm13 = vcmp.eq.f32.partialorder %v1391_v10, 8.507059e+37 }
 0x195   : > { %v3363_v18 = vpop.eup %3362  ;;  %v1431_v42 = vmul.f32 %v1380_v11, %v4206_v27  ;;  %v1385_v46 = vmul.f32 %v3361_v4, %v1384_v51  ;;  %v1394_v53 = vor.u32 1.1754944e-38, %v1393_v19  ;;  %v4340_v14 = vpack.c.b16 %v4329_v39, %v4263_v58 }
 0x196   : > { %v4336_v33 = vadd.f32 1.0, %v3363_v18  ;;  %v1510_v25 = vsel %vm3783_vm2, 0, %v1470_v34  ;;  %vm1402_vm14 = vweird.f32 %v4308_v55  ;;  %v1409_v43 = vor.u32 1.1754944e-38, %v1408_v16 }
 0x197   : > { %v1439_v27 = vpack.c.bf16 %v1431_v42, %v1431_v42  ;;  %v1386_v1 = vadd.f32 %v3361_v4, %v1385_v46  ;;  %v3365_v13 = vpop.eup %3364  ;;  %v1579_v58 = vsel %vm3819_vm8, %v1574_v17, %v4282_v37  ;;  %v4354_v31 = vpack.c.b16 %v4329_v39, %v4329_v39  ;;  %3001 = vmatmul.msk.bf16.gmra.mxu2 %vm1708_vm7, %v4340_v14 }
 0x198   : > { %3366 = vrcp.f32 %v4336_v33  ;;  %v4356_v5 = vpack.c.b16 %v1543_v12, %v1543_v12  ;;  %v1398_v48 = vmul.f32 %v3365_v13, %v4308_v55  ;;  %vm4361_vm0 = vcmp.eq.f32.partialorder %v1406_v24, 8.507059e+37 }
 0x199   : > { %v1472_v7 = vshrl.u32 %v1439_v27, 16  ;;  %v1390_v26 = vsel %vm1389_vm15, %v3361_v4, %v1386_v1  ;;  %v3005_v52 = vrot.slane %v4323_v36, 9  ;;  %v1475_v37 = vshll.u32 %v1439_v27, 16  ;;  %v3221_v27 = vld [vmem:[#allocation7 + $0x88] sm:$0xff]  ;;  %v3227_v1 = vld [vmem:[#allocation7 + $0xb8] sm:$0xff] }
 0x19a   : > { %v1395_v15 = vsel %vm4332_vm13, %v1394_v53, %v1390_v26  ;;  %v1421_v45 = vand.u32 2147483647, %v4336_v33  ;;  %v1423_v32 = vand.u32 2147483648, %v4336_v33  ;;  %v1399_v44 = vsub.f32 1.0, %v1398_v48  ;;  %2101 = vmatpush.bf16.msrb.mxu1 %v3221_v27  ;;  %2190 = vmatpush.bf16.msrb.mxu2 %v3227_v1 }
 0x19b   : > { %v1474_v54 = vrot.slane %v1472_v7, 7  ;;  %v1432_v47 = vmul.f32 %v1395_v15, %v4230_v57  ;;  %v4371_v61 = vunpack.c.l.b16 %v1579_v58  ;;  %v1829_v4 = vrot.slane %v4356_v5, 5 }
 0x19c   : > { %v1825_v59 = vrot.slane %v4286_v23, 5  ;;  %v3006_v60 = vrot.slane %v4354_v31, 9  ;;  %v1518_v9 = vsel %vm3787_vm5, %v1510_v25, 0  ;;  %v1400_v0 = vmul.f32 %v3365_v13, %v1399_v44 }
 0x19d   : > { %v1440_v29 = vpack.c.bf16 %v1432_v47, %v1432_v47  ;;  %vm1403_vm1 = vweird.f32 %v3365_v13  ;;  %vm1417_vm3 = vweird.f32 %v4336_v33  ;;  %v1680_v57 = vpack.c.b16 %v4371_v61, %v3847_v63 }
 0x19e   : > { %v3367_v10 = vpop.eup %3366  ;;  %v1424_v21 = vor.u32 1.1754944e-38, %v1423_v32  ;;  %v4383_v34 = vsel %vm3868_vm12, %v3005_v52, %v1825_v59  ;;  %v4387_v19 = vsel %vm3868_vm12, %v3006_v60, %v1829_v4  ;;  %v4389_v22 = vunpack.c.l.b16 %v1518_v9  ;;  %vm1404_vm6 = vmor %vm1402_vm14, %vm1403_vm1  ;;  %v3235_v60 = vld [vmem:[#allocation7 + $0xf8] sm:$0xff] }
 0x19f   : > { %v1477_v51 = vor.u32 %v1475_v37, %v1474_v54  ;;  %v1479_v16 = vshrl.u32 %v1440_v29, 16  ;;  %v1401_v56 = vadd.f32 %v3365_v13, %v1400_v0  ;;  %v1413_v50 = vmul.f32 %v3367_v10, %v4336_v33  ;;  %2980 = vmatmul.msk.bf16.vlgmr.msra.gmra.mxu1 %vm1708_vm7, %v1680_v57  ;;  %v3230_v33 = vld [vmem:[#allocation7 + $0xd0] sm:$0xff]  ;;  %2338 = vmatpush.bf16.msra.mxu0 %v3235_v60 }
 0x1a0   : > { %vm4392_vm4 = vcmp.eq.f32.partialorder %v1421_v45, 8.507059e+37  ;;  %v1482_v24 = vshll.u32 %v1440_v29, 16  ;;  %v1857_v18 = vunpack.c.l.b16 %v4383_v34  ;;  %v1858_v42 = vunpack.c.l.b16 %v4387_v19  ;;  %v3226_v45 = vld [vmem:[#allocation7 + $0xb0] sm:$0xff] }
 0x1a1   : > { %v1545_v46 = vunpack.c.h.b16 %v1518_v9  ;;  %v1481_v17 = vrot.slane %v1479_v16, 7  ;;  %v1405_v12 = vsel %vm1404_vm6, %v3365_v13, %v1401_v56  ;;  %v1414_v38 = vsub.f32 1.0, %v1413_v50  ;;  %2191 = vmatpush.bf16.msrb.mxu2 %v3226_v45 }
 0x1a2   : > { %vm1418_vm9 = vweird.f32 %v3367_v10  ;;  %v1410_v20 = vsel %vm4361_vm0, %v1409_v43, %v1405_v12  ;;  %v4408_v53 = vpack.c.b16 %v1858_v42, %v1857_v18  ;;  %v4412_v55 = vpack.c.b16 %v4389_v22, %v4389_v22 }
 0x1a3   : > { %v1952_v25 = vpack.c.b16 %v4389_v22, %v4329_v39  ;;  %v4416_v13 = vor.u32 %v1482_v24, %v1481_v17  ;;  %v1433_v58 = vmul.f32 %v1410_v20, %v4255_v30  ;;  %v1415_v43 = vmul.f32 %v3367_v10, %v1414_v38  ;;  %vm1419_vm10 = vmor %vm1417_vm3, %vm1418_vm9 }
 0x1a4   : > { %v1581_v7 = vshrl.u32 %v4323_v36, 16  ;;  %3028 = vmatmul.msk.bf16.gmra.mxu3 %vm1708_vm7, %v4408_v53  ;;  %v1584_v26 = vshll.u32 %v4323_v36, 16  ;;  %v1590_v48 = vshll.u32 %v4286_v23, 16  ;;  %v1595_v39 = vshrl.u32 %v4354_v31, 16 }
 0x1a5   : > { %3048 = vmatmul.msk.bf16.gmra.mxu0 %vm1708_vm7, %v1952_v25  ;;  %v1598_v49 = vshll.u32 %v4354_v31, 16  ;;  %v1441_v52 = vpack.c.bf16 %v1433_v58, %v1433_v58  ;;  %v1416_v37 = vadd.f32 %v3367_v10, %v1415_v43  ;;  %v4427_v15 = vpack.c.b16 %v1545_v46, %v1545_v46  ;;  %v3231_v31 = vld [vmem:[#allocation7 + $0xd8] sm:$0xff] }
 0x1a6   : > { %v1583_v30 = vrot.slane %v1581_v7, 4  ;;  %v1512_v32 = vsel %vm3783_vm2, 0, %v4416_v13  ;;  %v1586_v23 = vrot.slane %v1584_v26, 5  ;;  %v1597_v36 = vrot.slane %v1595_v39, 4  ;;  %2264 = vmatpush.bf16.msra.mxu3 %v3231_v31 }
 0x1a7   : > { %v1600_v54 = vrot.slane %v1598_v49, 5  ;;  %v1486_v47 = vshrl.u32 %v1441_v52, 16  ;;  %v1420_v44 = vsel %vm1419_vm10, %v3367_v10, %v1416_v37  ;;  %v1592_v4 = vrot.slane %v1590_v48, 5 }
 0x1a8   : > { %v1604_v59 = vshll.u32 %v4356_v5, 16  ;;  %v1425_v9 = vsel %vm4392_vm4, %v1424_v21, %v1420_v44  ;;  %v1587_v29 = vor.u32 %v1586_v23, %v1583_v30  ;;  %v1511_v57 = vsel %vm3783_vm2, 0, %v1477_v51  ;;  %v3225_v5 = vld [vmem:[#allocation7 + $0xa8] sm:$0xff] }
 0x1a9   : > { %v1601_v0 = vor.u32 %v1600_v54, %v1597_v36  ;;  %v1488_v16 = vrot.slane %v1486_v47, 7  ;;  %v1434_v56 = vmul.f32 %v1425_v9, %v4290_v8  ;;  %v1519_v10 = vsel %vm3787_vm5, %v1511_v57, 0  ;;  %2192 = vmatpush.bf16.msrb.mxu2 %v3225_v5 }
 0x1aa   : > { %v1606_v50 = vrot.slane %v1604_v59, 5  ;;  %v1588_v24 = vrot.slane %v1587_v29, 4  ;;  %v1546_v21 = vunpack.c.l.b16 %v1519_v10  ;;  %v1547_v46 = vunpack.c.h.b16 %v1519_v10  ;;  %2265 = vmatpush.bf16.msra.mxu3 %v3230_v33  ;;  %v3220_v29 = vld [vmem:[#allocation7 + $0x80] sm:$0xff] }
 0x1ab   : > { %v1602_v11 = vrot.slane %v1601_v0, 4  ;;  %v1489_v17 = vshll.u32 %v1441_v52, 16  ;;  %v1442_v12 = vpack.c.bf16 %v1434_v56, %v1434_v56  ;;  %v3007_v51 = vrot.slane %v4412_v55, 9  ;;  %v3224_v0 = vld [vmem:[#allocation7 + $0xa0] sm:$0xff]  ;;  %v3229_v56 = vld [vmem:[#allocation7 + $0xc8] sm:$0xff]  ;;  %2102 = vmatpush.bf16.msrb.mxu1 %v3220_v29 }
 0x1ac   : > { %v1833_v38 = vrot.slane %v4427_v15, 5  ;;  %v1593_v8 = vsel %vm3819_vm8, %v1588_v24, %v1592_v4  ;;  %v1560_v25 = vpack.c.b16 %v1546_v21, %v1546_v21  ;;  %v4449_v27 = vpack.c.b16 %v1547_v46, %v1547_v46 }
 0x1ad   : > { %v1607_v20 = vsel %vm3819_vm8, %v1602_v11, %v1606_v50  ;;  %v1491_v1 = vor.u32 %v1489_v17, %v1488_v16  ;;  %v1493_v13 = vshrl.u32 %v1442_v12, 16  ;;  %v4451_v58 = vunpack.c.l.b16 %v1593_v8  ;;  %v3234_v16 = vld [vmem:[#allocation7 + $0xf0] sm:$0xff]  ;;  %2193 = vmatpush.bf16.msrb.mxu2 %v3224_v0 }
 0x1ae   : > { %v4453_v43 = vunpack.c.l.b16 %v1607_v20  ;;  %v4456_v7 = vpack.c.b16 %v1546_v21, %v4389_v22  ;;  %v1837_v26 = vrot.slane %v4449_v27, 5  ;;  %v4461_v48 = vsel %vm3868_vm12, %v3007_v51, %v1833_v38  ;;  %2339 = vmatpush.bf16.msra.mxu0 %v3234_v16  ;;  %2266 = vmatpush.bf16.msra.mxu3 %v3229_v56  ;;  %v3228_v20 = vld [vmem:[#allocation7 + $0xc0] sm:$0xff] }
 0x1af   : > { %v3008_v39 = vrot.slane %v1560_v25, 9  ;;  %v1495_v49 = vrot.slane %v1493_v13, 7  ;;  %v1496_v52 = vshll.u32 %v1442_v12, 16  ;;  %v1859_v30 = vunpack.c.l.b16 %v4461_v48  ;;  %v3233_v12 = vld [vmem:[#allocation7 + $0xe8] sm:$0xff] }
 0x1b0   : > { %v4465_v37 = vpack.c.b16 %v4453_v43, %v4451_v58  ;;  %3002 = vmatmul.msk.bf16.gmra.mxu2 %vm1708_vm7, %v4456_v7  ;;  %v1520_v45 = vsel %vm3787_vm5, %v1512_v32, 0  ;;  %v1609_v23 = vshrl.u32 %v4412_v55, 16  ;;  %v1612_v36 = vshll.u32 %v4412_v55, 16 }
 0x1b1   : > { %v4472_v22 = vsel %vm3868_vm12, %v3008_v39, %v1837_v26  ;;  %v1498_v54 = vor.u32 %v1496_v52, %v1495_v49  ;;  %v1548_v47 = vunpack.c.l.b16 %v1520_v45  ;;  %v1549_v44 = vunpack.c.h.b16 %v1520_v45  ;;  %v3232_v45 = vld [vmem:[#allocation7 + $0xe0] sm:$0xff] }
 0x1b2   : > { %2981 = vmatmul.msk.bf16.gmra.mxu1 %vm1708_vm7, %v4465_v37  ;;  %v1860_v31 = vunpack.c.l.b16 %v4472_v22  ;;  %v1611_v4 = vrot.slane %v1609_v23, 4  ;;  %v1614_v59 = vrot.slane %v1612_v36, 5  ;;  %v1618_v60 = vshll.u32 %v4427_v15, 16  ;;  %2340 = vmatpush.bf16.msra.mxu0 %v3233_v12 }
 0x1b3   : > { %v1623_v9 = vshrl.u32 %v1560_v25, 16  ;;  %v1514_v32 = vsel %vm3783_vm2, 0, %v1498_v54  ;;  %v1562_v57 = vpack.c.b16 %v1548_v47, %v1548_v47  ;;  %v4490_v33 = vpack.c.b16 %v1549_v44, %v1549_v44  ;;  %2267 = vmatpush.bf16.msra.mxu3 %v3228_v20  ;;  %v3239_v20 = vld [vmem:[#allocation7 + $0x118] sm:$0xff] }
 0x1b4   : > { %v4488_v55 = vpack.c.b16 %v1860_v31, %v1859_v30  ;;  %v1953_v50 = vpack.c.b16 %v1548_v47, %v1546_v21  ;;  %v1615_v10 = vor.u32 %v1614_v59, %v1611_v4  ;;  %v1620_v15 = vrot.slane %v1618_v60, 5  ;;  %2412 = vmatpush.bf16.msra.mxu1 %v3239_v20 }
 0x1b5   : > { %v1625_v5 = vrot.slane %v1623_v9, 4  ;;  %v1626_v24 = vshll.u32 %v1560_v25, 16  ;;  %v1632_v11 = vshll.u32 %v4449_v27, 16  ;;  %v1513_v46 = vsel %vm3783_vm2, 0, %v1491_v1 }
 0x1b6   : > { %3029 = vmatmul.msk.bf16.gmra.mxu3 %vm1708_vm7, %v4488_v55  ;;  %v3009_v17 = vrot.slane %v1562_v57, 9  ;;  %3049 = vmatmul.msk.bf16.gmra.mxu0 %vm1708_vm7, %v1953_v50  ;;  %v1616_v21 = vrot.slane %v1615_v10, 4  ;;  %v1521_v51 = vsel %vm3787_vm5, %v1513_v46, 0  ;;  %v1841_v38 = vrot.slane %v4490_v33, 5 }
 0x1b7   : > { %v1522_v8 = vsel %vm3787_vm5, %v1514_v32, 0  ;;  %v1628_v25 = vrot.slane %v1626_v24, 5  ;;  %v1550_v27 = vunpack.c.l.b16 %v1521_v51  ;;  %v1551_v2 = vunpack.c.h.b16 %v1521_v51  ;;  %2341 = vmatpush.bf16.msra.mxu0 %v3232_v45 }
 0x1b8   : > { %v1621_v1 = vsel %vm3819_vm8, %v1616_v21, %v1620_v15  ;;  %v4505_v13 = vunpack.c.l.b16 %v1522_v8  ;;  %v2028_v52 = vunpack.c.h.b16 %v1522_v8  ;;  %v1634_v23 = vrot.slane %v1632_v11, 5 }
 0x1b9   : > { %v1629_v26 = vor.u32 %v1628_v25, %v1625_v5  ;;  %v1564_v39 = vpack.c.b16 %v1550_v27, %v1550_v27  ;;  %v1565_v49 = vpack.c.b16 %v1551_v2, %v1551_v2  ;;  %v4507_v36 = vunpack.c.l.b16 %v1621_v1 }
 0x1ba   : > { %v4511_v3 = vsel %vm3868_vm12, %v3009_v17, %v1841_v38  ;;  %v1954_v54 = vpack.c.b16 %v4505_v13, %v1550_v27  ;;  %v4514_v4 = vpack.c.b16 %v1550_v27, %v1548_v47  ;;  %v2029_v9 = vpack.c.b16 %v4505_v13, %v4505_v13 }
 0x1bb   : > { %v1630_v44 = vrot.slane %v1629_v26, 4  ;;  %v1845_v59 = vrot.slane %v1565_v49, 5  ;;  %v3010_v60 = vrot.slane %v1564_v39, 9  ;;  %v1637_v29 = vshrl.u32 %v1562_v57, 16 }
 0x1bc   : > { %v1640_v0 = vshll.u32 %v1562_v57, 16  ;;  %v1651_v32 = vshrl.u32 %v1564_v39, 16  ;;  %v2030_v50 = vpack.c.b16 %v2028_v52, %v2028_v52  ;;  %v1654_v10 = vshll.u32 %v1564_v39, 16 }
 0x1bd   : > { %v1635_v16 = vsel %vm3819_vm8, %v1630_v44, %v1634_v23  ;;  %v1846_v56 = vsel %vm3868_vm12, %v3010_v60, %v1845_v59  ;;  %v1639_v5 = vrot.slane %v1637_v29, 4  ;;  %v1861_v11 = vunpack.c.l.b16 %v4511_v3 }
 0x1be   : > { %v4522_v15 = vunpack.c.l.b16 %v1635_v16  ;;  %v1862_v47 = vunpack.c.l.b16 %v1846_v56  ;;  %v1642_v24 = vrot.slane %v1640_v0, 5  ;;  %v1653_v46 = vrot.slane %v1651_v32, 4 }
 0x1bf   : > { %v1656_v17 = vrot.slane %v1654_v10, 5  ;;  %v1660_v12 = vshll.u32 %v1565_v49, 16  ;;  %v3071_v8 = vrot.slane %v2029_v9, 9  ;;  %v2134_v25 = vrot.slane %v2030_v50, 5 }
 0x1c0   : > { %v1682_v57 = vpack.c.b16 %v4522_v15, %v4507_v36  ;;  %3003 = vmatmul.msk.bf16.gmra.mxu2 %vm1708_vm7, %v4514_v4  ;;  %v4529_v21 = vpack.c.b16 %v1862_v47, %v1861_v11  ;;  %v1643_v51 = vor.u32 %v1642_v24, %v1639_v5  ;;  %v2032_v27 = vshrl.u32 %v2029_v9, 16 }
 0x1c1   : > { %v1657_v38 = vor.u32 %v1656_v17, %v1653_v46  ;;  %v1646_v2 = vshll.u32 %v4490_v33, 16  ;;  %v2035_v26 = vshll.u32 %v2029_v9, 16  ;;  %v1662_v39 = vrot.slane %v1660_v12, 5 }
 0x1c2   : > { %2982 = vmatmul.msk.bf16.gmra.mxu1 %vm1708_vm7, %v1682_v57  ;;  %v4535_v52 = vsel %vm3868_vm12, %v3071_v8, %v2134_v25  ;;  %v2034_v49 = vrot.slane %v2032_v27, 4  ;;  %v1644_v45 = vrot.slane %v1643_v51, 4  ;;  %v2041_v44 = vshll.u32 %v2030_v50, 16 }
 0x1c3   : > { %v1658_v1 = vrot.slane %v1657_v38, 4  ;;  %v2145_v23 = vunpack.c.l.b16 %v4535_v52  ;;  %v2037_v3 = vrot.slane %v2035_v26, 5  ;;  %v1648_v33 = vrot.slane %v1646_v2, 5  ;;  %v3242_v52 = vld [vmem:[#allocation8 + $0x10] sm:$0xff] }
 0x1c4   : > { %v2043_v0 = vrot.slane %v2041_v44, 5  ;;  %v2147_v40 = vpack.c.b16 %v1859_v30, %v1858_v42  ;;  %v2055_v28 = vpack.c.b16 %v4451_v58, %v4371_v61  ;;  %v2056_v34 = vpack.c.b16 %v4507_v36, %v4453_v43  ;;  %v3236_v61 = vld [vmem:[#allocation7 + $0x100] sm:$0xff] }
 0x1c5   : > { %v1663_v59 = vsel %vm3819_vm8, %v1658_v1, %v1662_v39  ;;  %v2149_v35 = vpack.c.b16 %v2145_v23, %v1862_v47  ;;  %v2038_v60 = vor.u32 %v2037_v3, %v2034_v49  ;;  %v1649_v9 = vsel %vm3819_vm8, %v1644_v45, %v1648_v33  ;;  %v3238_v47 = vld [vmem:[#allocation7 + $0x110] sm:$0xff] }
 0x1c6   : > { %3030 = vmatmul.msk.bf16.gmra.mxu3 %vm1708_vm7, %v4529_v21  ;;  %3050 = vmatmul.msk.bf16.gmra.mxu0 %vm1708_vm7, %v1954_v54  ;;  %v1679_v32 = vunpack.c.l.b16 %v1663_v59  ;;  %v1678_v56 = vunpack.c.l.b16 %v1649_v9  ;;  %v2146_v54 = vpack.c.b16 %v1857_v18, %v1856_v62  ;;  %v3237_v62 = vld [vmem:[#allocation7 + $0x108] sm:$0xff]  ;;  %v2232_v18 = vpack.c.b16 %v3795_v6, %v4505_v13 }
 0x1c7   : > { %v2039_v29 = vrot.slane %v2038_v60, 4  ;;  %2413 = vmatpush.bf16.msra.mxu1 %v3238_v47  ;;  %v2380_v33 = vpack.c.b16 %v4002_v41, %v2145_v23 }
 0x1c8   : > { %v1683_v10 = vpack.c.b16 %v1679_v32, %v1678_v56  ;;  %v2057_v19 = vpack.c.b16 %v1678_v56, %v4522_v15 }
 0x1c9   : > { %v2044_v16 = vsel %vm3819_vm8, %v2039_v29, %v2043_v0 }
 0x1ca   : > { %v2054_v50 = vunpack.c.l.b16 %v2044_v16  ;;  %v3243_v16 = vld [vmem:[#allocation8 + $0x18] sm:$0xff] }
 0x1cb   : > { %2414 = vmatpush.bf16.msra.mxu1 %v3237_v62  ;;  %2673 = vmatpush.bf16.msra.mxu2 %v3243_v16 }
 0x1cc   : > { %v2058_v5 = vpack.c.b16 %v2054_v50, %v1679_v32  ;;  %v2306_v42 = vpack.c.b16 %v3847_v63, %v2054_v50 }
 0x1cf   : > { %2415 = vmatpush.bf16.msra.mxu1 %v3236_v61  ;;  %2674 = vmatpush.bf16.msra.mxu2 %v3242_v52 }
 0x1d0   : > { %3088 = vmatmul.msk.bf16.vlgmr.msrb.gmra.mxu2 %vm1708_vm7, %v2146_v54 }
 0x1d2   : > { %2983 = vmatmul.msk.bf16.gmra.mxu1 %vm1708_vm7, %v1683_v10 }
 0x1d6   : > { %3108 = vmatmul.msk.bf16.vlgmr.msra.gmra.mxu3 %vm1708_vm7, %v4340_v14  ;;  %3128 = vmatmul.msk.bf16.vlgmr.msra.gmra.mxu0 %vm1708_vm7, %v4465_v37  ;;  %v2148_v14 = vpack.c.b16 %v1861_v11, %v1860_v31 }
 0x1e0   : > { %3089 = vmatmul.msk.bf16.gmra.mxu2 %vm1708_vm7, %v2147_v40 }
 0x1e2   : > { %3067 = vmatmul.msk.bf16.vlgmr.msrb.gmra.mxu1 %vm1708_vm7, %v2055_v28 }
 0x1e6   : > { %3109 = vmatmul.msk.bf16.gmra.mxu3 %vm1708_vm7, %v4456_v7  ;;  %3129 = vmatmul.msk.bf16.gmra.mxu0 %vm1708_vm7, %v1682_v57 }
 0x1f0   : > { %3090 = vmatmul.msk.bf16.gmra.mxu2 %vm1708_vm7, %v2148_v14 }
 0x1f2   : > { %3068 = vmatmul.msk.bf16.gmra.mxu1 %vm1708_vm7, %v2056_v34 }
 0x1f6   : > { %3110 = vmatmul.msk.bf16.gmra.mxu3 %vm1708_vm7, %v4514_v4  ;;  %3130 = vmatmul.msk.bf16.gmra.mxu0 %vm1708_vm7, %v1683_v10 }
 0x200   : > { %3091 = vmatmul.msk.bf16.gmra.mxu2 %vm1708_vm7, %v2149_v35 }
 0x202   : > { %3069 = vmatmul.msk.bf16.gmra.mxu1 %vm1708_vm7, %v2057_v19 }
 0x206   : > { %3111 = vmatmul.msk.bf16.gmra.mxu3 %vm1708_vm7, %v2232_v18  ;;  %3131 = vmatmul.msk.bf16.gmra.mxu0 %vm1708_vm7, %v2306_v42 }
 0x207   : > { %v1799_v58 = vpop.f32.mrf.mxu2 }
 0x20b   : > { %v2000_v7 = vpop.f32.mrf.mxu0 }
 0x20f   : > { %v1801_v30 = vpop.f32.mrf.mxu2 }
 0x212   : > { %3070 = vmatmul.msk.bf16.gmra.mxu1 %vm1708_vm7, %v2058_v5  ;;  %v1912_v43 = vpop.f32.mrf.mxu3 }
 0x213   : > { %v4588_v36 = vpop.f32.mrf.mxu0 }
 0x21a   : > { %v1914_v31 = vpop.f32.mrf.mxu3  ;;  %v1804_v63 = vpop.f32.mrf.mxu2 }
 0x21c   : > { %v1730_v48 = vpop.f32.mrf.mxu1 }
 0x21d   : > { %v1800_v37 = vadd.f32 %v1799_v58, %v1730_v48 }
 0x21f   : > { %v1932_v22 = vadd.f32 %v1912_v43, %v1800_v37 }
 0x221   : > { %v2020_v4 = vadd.f32 %v2000_v7, %v1932_v22 }
 0x222   : > { %3148 = vmatmul.msk.bf16.vlgmr.msra.gmra.mxu1 %vm1708_vm7, %v4408_v53  ;;  %v2005_v15 = vpop.f32.mrf.mxu0  ;;  %v4592_v17 = vpop.f32.mrf.mxu2 }
 0x224   : > { %v1732_v6 = vpop.f32.mrf.mxu1 }
 0x225   : > { %v1802_v61 = vadd.f32 %v1801_v30, %v1732_v6  ;;  %v4634_v30 = vld [vmem:[%s4783_s4] ss:$0 sm:$0xff] }
 0x227   : > { %v1917_v13 = vpop.f32.mrf.mxu3  ;;  %v1933_v42 = vadd.f32 %v1914_v31, %v1802_v61 }
 0x229   : > { %v2021_v37 = vadd.f32 %v4588_v36, %v1933_v42 }
 0x22a   : > { %v4598_v51 = vpop.f32.mrf.mxu0 }
 0x22f   : > { %v1735_v24 = vpop.f32.mrf.mxu1  ;;  %v4596_v57 = vpop.f32.mrf.mxu3 }
 0x230   : > { %v1805_v11 = vadd.f32 %v1804_v63, %v1735_v24 }
 0x232   : > { %v1934_v46 = vadd.f32 %v1917_v13, %v1805_v11  ;;  %3149 = vmatmul.msk.bf16.gmra.mxu1 %vm1708_vm7, %v4488_v55 }
 0x233   : > { %v1809_v8 = vpop.f32.mrf.mxu2  ;;  %v2010_v20 = vpop.f32.mrf.mxu0 }
 0x234   : > { %v2022_v12 = vadd.f32 %v2005_v15, %v1934_v46 }
 0x237   : > { %v1737_v38 = vpop.f32.mrf.mxu1 }
 0x238   : > { %v1807_v31 = vadd.f32 %v4592_v17, %v1737_v38 }
 0x239   : > { %v1922_v53 = vpop.f32.mrf.mxu3 }
 0x23a   : > { %v1935_v36 = vadd.f32 %v4596_v57, %v1807_v31 }
 0x23b   : > { %v4602_v26 = vpop.f32.mrf.mxu2  ;;  %v4608_v49 = vpop.f32.mrf.mxu0 }
 0x23f   : > { %v1740_v25 = vpop.f32.mrf.mxu1 }
 0x240   : > { %v1810_v27 = vadd.f32 %v1809_v8, %v1740_v25 }
 0x241   : > { %v4606_v55 = vpop.f32.mrf.mxu3 }
 0x242   : > { %v1936_v2 = vadd.f32 %v1922_v53, %v1810_v27  ;;  %3150 = vmatmul.msk.bf16.gmra.mxu1 %vm1708_vm7, %v4529_v21 }
 0x243   : > { %v1814_v45 = vpop.f32.mrf.mxu2  ;;  %v2015_v21 = vpop.f32.mrf.mxu0 }
 0x244   : > { %v2024_v1 = vadd.f32 %v2010_v20, %v1936_v2 }
 0x247   : > { %v4604_v39 = vpop.f32.mrf.mxu1 }
 0x249   : > { %v1927_v59 = vpop.f32.mrf.mxu3 }
 0x24b   : > { %v4616_v10 = vpop.f32.mrf.mxu2  ;;  %v4622_v47 = vpop.f32.mrf.mxu0 }
 0x24f   : > { %v1745_v3 = vpop.f32.mrf.mxu1 }
 0x250   : > { %v1815_v44 = vadd.f32 %v1814_v45, %v1745_v3 }
 0x251   : > { %v4618_v23 = vpop.f32.mrf.mxu3 }
 0x252   : > { %v1938_v35 = vadd.f32 %v1927_v59, %v1815_v44  ;;  %3151 = vmatmul.msk.bf16.gmra.mxu1 %vm1708_vm7, %v2380_v33  ;;  %v3241_v33 = vld [vmem:[#allocation8 + $0x8] sm:$0xff] }
 0x253   : > { %v2195_v40 = vpop.f32.mrf.mxu2  ;;  %v2343_v14 = vpop.f32.mrf.mxu0  ;;  %2675 = vmatpush.bf16.msra.mxu2 %v3241_v33 }
 0x254   : > { %v2026_v60 = vadd.f32 %v2015_v21, %v1938_v35  ;;  %v1812_v21 = vadd.f32 %v4602_v26, %v4604_v39 }
 0x257   : > { %v4614_v9 = vpop.f32.mrf.mxu1 }
 0x259   : > { %v2269_v62 = vpop.f32.mrf.mxu3 }
 0x25b   : > { %v2197_v19 = vpop.f32.mrf.mxu2  ;;  %v2345_v48 = vpop.f32.mrf.mxu0 }
 0x25f   : > { %v2104_v29 = vpop.f32.mrf.mxu1 }
 0x260   : > { %v2124_v0 = vadd.f32 %v2104_v29, %v2020_v4 }
 0x261   : > { %v2271_v58 = vpop.f32.mrf.mxu3 }
 0x262   : > { %v2215_v43 = vadd.f32 %v2195_v40, %v2124_v0 }
 0x263   : > { %v2200_v63 = vpop.f32.mrf.mxu2 }
 0x264   : > { %v2289_v22 = vadd.f32 %v2269_v62, %v2215_v43 }
 0x266   : > { %v2363_v24 = vadd.f32 %v2343_v14, %v2289_v22 }
 0x267   : > { %v2106_v32 = vpop.f32.mrf.mxu1 }
 0x268   : > { %v2125_v4 = vadd.f32 %v2106_v32, %v2021_v37 }
 0x269   : > { %v2274_v15 = vpop.f32.mrf.mxu3 }
 0x26a   : > { %v2216_v13 = vadd.f32 %v2197_v19, %v2125_v4 }
 0x26b   : > { %v2202_v53 = vpop.f32.mrf.mxu2 }
 0x26c   : > { %v2290_v46 = vadd.f32 %v2271_v58, %v2216_v13 }
 0x26e   : > { %v2364_v27 = vadd.f32 %v2345_v48, %v2290_v46  ;;  %v1817_v46 = vadd.f32 %v4616_v10, %v4614_v9 }
 0x26f   : > { %v2109_v56 = vpop.f32.mrf.mxu1 }
 0x270   : > { %v2126_v50 = vadd.f32 %v2109_v56, %v2022_v12  ;;  %v2348_v12 = vpop.f32.mrf.mxu0  ;;  %v1937_v56 = vadd.f32 %v4606_v55, %v1812_v21  ;;  %v1939_v33 = vadd.f32 %v4618_v23, %v1817_v46 }
 0x271   : > { %v2276_v45 = vpop.f32.mrf.mxu3 }
 0x272   : > { %v2217_v25 = vadd.f32 %v2200_v63, %v2126_v50  ;;  %v2025_v62 = vadd.f32 %v4608_v49, %v1937_v56 }
 0x274   : > { %v2291_v17 = vadd.f32 %v2274_v15, %v2217_v25 }
 0x276   : > { %v2365_v0 = vadd.f32 %v2348_v12, %v2291_v17 }
 0x277   : > { %v2111_v54 = vpop.f32.mrf.mxu1 }
 0x278   : > { %v2350_v35 = vpop.f32.mrf.mxu0 }
 0x27f   : > { %v2114_v41 = vpop.f32.mrf.mxu1 }
 0x280   : > { %v4620_v5 = vadd.f32 %v2114_v41, %v2024_v1  ;;  %v2023_v1 = vadd.f32 %v4598_v51, %v1935_v36  ;;  %v2205_v51 = vpop.f32.mrf.mxu2  ;;  %v2353_v61 = vpop.f32.mrf.mxu0 }
 0x282   : > { %v2127_v38 = vadd.f32 %v2111_v54, %v2023_v1  ;;  %v2279_v54 = vpop.f32.mrf.mxu3  ;;  %v2219_v40 = vadd.f32 %v2205_v51, %v4620_v5 }
 0x284   : > { %v2218_v29 = vadd.f32 %v2202_v53, %v2127_v38  ;;  %v2293_v22 = vadd.f32 %v2279_v54, %v2219_v40  ;;  %v2027_v54 = vadd.f32 %v4622_v47, %v1939_v33 }
 0x286   : > { %v2292_v50 = vadd.f32 %v2276_v45, %v2218_v29 }
 0x287   : > { %v4624_v28 = vpop.f32.mrf.mxu1 }
 0x288   : > { %v2366_v55 = vadd.f32 %v2350_v35, %v2292_v50  ;;  %v2129_v42 = vadd.f32 %v4624_v28, %v2025_v62  ;;  %v2207_v43 = vpop.f32.mrf.mxu2  ;;  %v2367_v28 = vadd.f32 %v2353_v61, %v2293_v22 }
 0x28a   : > { %v2220_v49 = vadd.f32 %v2207_v43, %v2129_v42  ;;  %v2281_v13 = vpop.f32.mrf.mxu3 }
 0x28c   : > { %v2294_v12 = vadd.f32 %v2281_v13, %v2220_v49 }
 0x28f   : > { %v2119_v34 = vpop.f32.mrf.mxu1 }
 0x290   : > { %v4626_v18 = vadd.f32 %v2119_v34, %v2026_v60  ;;  %v3240_v34 = vld [vmem:[#allocation8] sm:$0xff]  ;;  %v2210_v9 = vpop.f32.mrf.mxu2 }
 0x291   : > { %2676 = vmatpush.bf16.msra.mxu2 %v3240_v34 }
 0x292   : > { %v2221_v51 = vadd.f32 %v2210_v9, %v4626_v18  ;;  %v2284_v56 = vpop.f32.mrf.mxu3 }
 0x297   : > { %v4628_v7 = vpop.f32.mrf.mxu1 }
 0x298   : > { %v2131_v34 = vadd.f32 %v4628_v7, %v2027_v54 }
 0x29f   : > { %v2417_v6 = vpop.f32.mrf.mxu1 }
 0x2a0   : > { %v2437_v11 = vadd.f32 %v2417_v6, %v2363_v24 }
 0x2a2   : > { %v4638_v8 = vadd.f32 %v4634_v30, %v2437_v11 }
 0x2a4   : > { %v3152_v20 = vmul.f32 -1.442695, %v4638_v8 }
 0x2a6   : > { %3368 = vpow2.f32 %v3152_v20  ;;  %v2355_v20 = vpop.f32.mrf.mxu0 }
 0x2a7   : > { %v2419_v2 = vpop.f32.mrf.mxu1  ;;  %v2368_v35 = vadd.f32 %v2355_v20, %v2294_v12 }
 0x2a8   : > { %v2438_v3 = vadd.f32 %v2419_v2, %v2364_v27 }
 0x2aa   : > { %v4644_v44 = vadd.f32 %v4634_v30, %v2438_v3 }
 0x2ac   : > { %v3369_v59 = vpop.eup %3368  ;;  %v3153_v57 = vmul.f32 -1.442695, %v4644_v44 }
 0x2ad   : > { %v4649_v60 = vadd.f32 1.0, %v3369_v59 }
 0x2ae   : > { %3370 = vpow2.f32 %v3153_v57  ;;  %v2358_v61 = vpop.f32.mrf.mxu0 }
 0x2af   : > { %3372 = vrcp.f32 %v4649_v60  ;;  %v2422_v32 = vpop.f32.mrf.mxu1  ;;  %v2500_v36 = vand.u32 2147483648, %v4649_v60  ;;  %vm2494_vm5 = vweird.f32 %v4649_v60  ;;  %v2498_v25 = vand.u32 2147483647, %v4649_v60 }
 0x2b0   : > { %v2439_v16 = vadd.f32 %v2422_v32, %v2365_v0 }
 0x2b1   : > { %v2501_v59 = vor.u32 1.1754944e-38, %v2500_v36  ;;  %vm2499_vm11 = vcmp.eq.f32.partialorder %v2498_v25, 8.507059e+37 }
 0x2b2   : > { %v4654_v52 = vadd.f32 %v4634_v30, %v2439_v16 }
 0x2b4   : > { %v3371_v41 = vpop.eup %3370  ;;  %v3154_v26 = vmul.f32 -1.442695, %v4654_v52 }
 0x2b5   : > { %v3373_v39 = vpop.eup %3372  ;;  %v2482_v14 = vadd.f32 1.0, %v3371_v41 }
 0x2b6   : > { %v2490_v19 = vmul.f32 %v3373_v39, %v4649_v60  ;;  %3374 = vpow2.f32 %v3154_v26  ;;  %vm2495_vm2 = vweird.f32 %v3373_v39  ;;  %v2360_v25 = vpop.f32.mrf.mxu0 }
 0x2b7   : > { %3376 = vrcp.f32 %v2482_v14  ;;  %v2424_v58 = vpop.f32.mrf.mxu1  ;;  %vm4673_vm8 = vmor %vm2494_vm5, %vm2495_vm2  ;;  %v2513_v45 = vand.u32 2147483647, %v2482_v14  ;;  %v2515_v3 = vand.u32 2147483648, %v2482_v14  ;;  %vm2509_vm13 = vweird.f32 %v2482_v14 }
 0x2b8   : > { %v2491_v48 = vsub.f32 1.0, %v2490_v19  ;;  %v2440_v37 = vadd.f32 %v2424_v58, %v2366_v55  ;;  %v2212_v58 = vpop.f32.mrf.mxu2 }
 0x2b9   : > { %v2516_v32 = vor.u32 1.1754944e-38, %v2515_v3  ;;  %vm2514_vm15 = vcmp.eq.f32.partialorder %v2513_v45, 8.507059e+37 }
 0x2ba   : > { %v2492_v4 = vmul.f32 %v3373_v39, %v2491_v48  ;;  %v4662_v5 = vadd.f32 %v4634_v30, %v2440_v37 }
 0x2bc   : > { %v3375_v63 = vpop.eup %3374  ;;  %v3155_v15 = vmul.f32 -1.442695, %v4662_v5  ;;  %v2493_v31 = vadd.f32 %v3373_v39, %v2492_v4 }
 0x2bd   : > { %v3377_v24 = vpop.eup %3376  ;;  %v4665_v6 = vadd.f32 1.0, %v3375_v63  ;;  %v2286_v63 = vpop.f32.mrf.mxu3 }
 0x2be   : > { %v2505_v11 = vmul.f32 %v3377_v24, %v2482_v14  ;;  %3378 = vpow2.f32 %v3155_v15  ;;  %v2497_v10 = vsel %vm4673_vm8, %v3373_v39, %v2493_v31  ;;  %vm2510_vm12 = vweird.f32 %v3377_v24 }
 0x2bf   : > { %3380 = vrcp.f32 %v4665_v6  ;;  %v2427_v53 = vpop.f32.mrf.mxu1  ;;  %v2502_v0 = vsel %vm2499_vm11, %v2501_v59, %v2497_v10  ;;  %vm2511_vm14 = vmor %vm2509_vm13, %vm2510_vm12  ;;  %v2295_v14 = vadd.f32 %v2284_v56, %v2221_v51  ;;  %v2530_v4 = vand.u32 2147483648, %v4665_v6 }
 0x2c0   : > { %v2506_v27 = vsub.f32 1.0, %v2505_v11  ;;  %v2441_v2 = vadd.f32 %v2427_v53, %v2367_v28  ;;  %v2609_v18 = vmul.f32 %v2502_v0, %v4638_v8  ;;  %vm2524_vm1 = vweird.f32 %v4665_v6 }
 0x2c1   : > { %v2369_v37 = vadd.f32 %v2358_v61, %v2295_v14  ;;  %v2528_v13 = vand.u32 2147483647, %v4665_v6 }
 0x2c2   : > { %v2507_v17 = vmul.f32 %v3377_v24, %v2506_v27  ;;  %v4680_v38 = vadd.f32 %v4634_v30, %v2441_v2 }
 0x2c3   : > { %vm2529_vm6 = vcmp.eq.f32.partialorder %v2528_v13, 8.507059e+37 }
 0x2c4   : > { %v3379_v57 = vpop.eup %3378  ;;  %v2508_v21 = vadd.f32 %v3377_v24, %v2507_v17  ;;  %v3156_v60 = vmul.f32 -1.442695, %v4680_v38 }
 0x2c5   : > { %v4684_v29 = vpop.eup %3380  ;;  %v4687_v16 = vadd.f32 1.0, %v3379_v57 }
 0x2c6   : > { %v2512_v50 = vsel %vm2511_vm14, %v3377_v24, %v2508_v21  ;;  %v2520_v23 = vmul.f32 %v4684_v29, %v4665_v6  ;;  %3382 = vpow2.f32 %v3156_v60  ;;  %vm2525_vm0 = vweird.f32 %v4684_v29 }
 0x2c7   : > { %v2517_v41 = vsel %vm2514_vm15, %v2516_v32, %v2512_v50  ;;  %3384 = vrcp.f32 %v4687_v16  ;;  %v2429_v26 = vpop.f32.mrf.mxu1  ;;  %vm4711_vm3 = vmor %vm2524_vm1, %vm2525_vm0  ;;  %v2543_v11 = vand.u32 2147483647, %v4687_v16  ;;  %v2545_v46 = vand.u32 2147483648, %v4687_v16 }
 0x2c8   : > { %v2610_v39 = vmul.f32 %v2517_v41, %v4644_v44  ;;  %v2521_v40 = vsub.f32 1.0, %v2520_v23  ;;  %v2442_v62 = vadd.f32 %v2429_v26, %v2368_v35  ;;  %v2222_v44 = vadd.f32 %v2212_v58, %v2131_v34 }
 0x2c9   : > { %v2531_v6 = vor.u32 1.1754944e-38, %v2530_v4  ;;  %vm2539_vm9 = vweird.f32 %v4687_v16  ;;  %v2546_v3 = vor.u32 1.1754944e-38, %v2545_v46  ;;  %vm2544_vm2 = vcmp.eq.f32.partialorder %v2543_v11, 8.507059e+37 }
 0x2ca   : > { %v2617_v19 = vpack.c.bf16 %v2610_v39, %v2609_v18  ;;  %v2522_v55 = vmul.f32 %v4684_v29, %v2521_v40  ;;  %v4698_v42 = vadd.f32 %v4634_v30, %v2442_v62  ;;  %v2296_v28 = vadd.f32 %v2286_v63, %v2222_v44 }
 0x2cc   : > { %v3383_v47 = vpop.eup %3382  ;;  %v3157_v43 = vmul.f32 -1.442695, %v4698_v42  ;;  %3176 = vmatmul.msk.bf16.vlgmr.msra.gmra.mxu2 %vm1708_vm7, %v2617_v19  ;;  %v2523_v7 = vadd.f32 %v4684_v29, %v2522_v55  ;;  %v2370_v10 = vadd.f32 %v2360_v25, %v2296_v28 }
 0x2cd   : > { %v3385_v8 = vpop.eup %3384  ;;  %v4702_v48 = vadd.f32 1.0, %v3383_v47 }
 0x2ce   : > { %v2535_v22 = vmul.f32 %v3385_v8, %v4687_v16  ;;  %3386 = vpow2.f32 %v3157_v43  ;;  %v2527_v12 = vsel %vm4711_vm3, %v4684_v29, %v2523_v7  ;;  %vm2540_vm4 = vweird.f32 %v3385_v8 }
 0x2cf   : > { %3388 = vrcp.f32 %v4702_v48  ;;  %v2432_v49 = vpop.f32.mrf.mxu1  ;;  %v2532_v45 = vsel %vm2529_vm6, %v2531_v6, %v2527_v12  ;;  %vm2541_vm10 = vmor %vm2539_vm9, %vm2540_vm4  ;;  %vm2554_vm8 = vweird.f32 %v4702_v48 }
 0x2d0   : > { %v2536_v15 = vsub.f32 1.0, %v2535_v22  ;;  %v2443_v24 = vadd.f32 %v2432_v49, %v2369_v37  ;;  %v2611_v57 = vmul.f32 %v2532_v45, %v4654_v52  ;;  %v2560_v52 = vand.u32 2147483648, %v4702_v48 }
 0x2d2   : > { %v2537_v36 = vmul.f32 %v3385_v8, %v2536_v15  ;;  %v4721_v53 = vadd.f32 %v4634_v30, %v2443_v24  ;;  %v2561_v62 = vor.u32 1.1754944e-38, %v2560_v52 }
 0x2d4   : > { %v3387_v20 = vpop.eup %3386  ;;  %v2538_v27 = vadd.f32 %v3385_v8, %v2537_v36  ;;  %v3158_v2 = vmul.f32 -1.442695, %v4721_v53 }
 0x2d5   : > { %v3389_v1 = vpop.eup %3388  ;;  %v2486_v9 = vadd.f32 1.0, %v3387_v20 }
 0x2d6   : > { %v2542_v17 = vsel %vm2541_vm10, %v3385_v8, %v2538_v27  ;;  %v2550_v33 = vmul.f32 %v3389_v1, %v4702_v48  ;;  %3390 = vpow2.f32 %v3158_v2  ;;  %vm2555_vm5 = vweird.f32 %v3389_v1 }
 0x2d7   : > { %v2547_v59 = vsel %vm2544_vm2, %v2546_v3, %v2542_v17  ;;  %3392 = vrcp.f32 %v2486_v9  ;;  %v2434_v35 = vpop.f32.mrf.mxu1  ;;  %vm2556_vm12 = vmor %vm2554_vm8, %vm2555_vm5  ;;  %v2575_v26 = vand.u32 2147483648, %v2486_v9  ;;  %v2573_v40 = vand.u32 2147483647, %v2486_v9 }
 0x2d8   : > { %v2612_v21 = vmul.f32 %v2547_v59, %v4662_v5  ;;  %v2551_v60 = vsub.f32 1.0, %v2550_v33  ;;  %v2444_v29 = vadd.f32 %v2434_v35, %v2370_v10  ;;  %v2558_v5 = vand.u32 2147483647, %v4702_v48 }
 0x2d9   : > { %vm2569_vm14 = vweird.f32 %v2486_v9  ;;  %v2576_v55 = vor.u32 1.1754944e-38, %v2575_v26  ;;  %vm2574_vm0 = vcmp.eq.f32.partialorder %v2573_v40, 8.507059e+37 }
 0x2da   : > { %v2618_v51 = vpack.c.bf16 %v2612_v21, %v2611_v57  ;;  %v2552_v0 = vmul.f32 %v3389_v1, %v2551_v60  ;;  %v4729_v32 = vadd.f32 %v4634_v30, %v2444_v29  ;;  %vm2559_vm13 = vcmp.eq.f32.partialorder %v2558_v5, 8.507059e+37 }
 0x2dc   : > { %v3391_v16 = vpop.eup %3390  ;;  %v3159_v56 = vmul.f32 -1.442695, %v4729_v32  ;;  %3177 = vmatmul.msk.bf16.gmra.mxu2 %vm1708_vm7, %v2618_v51  ;;  %v2553_v54 = vadd.f32 %v3389_v1, %v2552_v0 }
 0x2dd   : > { %v3393_v50 = vpop.eup %3392  ;;  %v2487_v23 = vadd.f32 1.0, %v3391_v16 }
 0x2de   : > { %v2565_v41 = vmul.f32 %v3393_v50, %v2486_v9  ;;  %3394 = vpow2.f32 %v3159_v56  ;;  %v2557_v18 = vsel %vm2556_vm12, %v3389_v1, %v2553_v54  ;;  %vm2570_vm11 = vweird.f32 %v3393_v50  ;;  %v3335_v1 = vld [vmem:[%s4785_s6] ss:$0 sm:$0xff] }
 0x2df   : > { %3396 = vrcp.f32 %v2487_v23  ;;  %v2562_v19 = vsel %vm2559_vm13, %v2561_v62, %v2557_v18  ;;  %vm2571_vm15 = vmor %vm2569_vm14, %vm2570_vm11  ;;  %v2590_v13 = vand.u32 2147483648, %v2487_v23  ;;  %vm2584_vm3 = vweird.f32 %v2487_v23 }
 0x2e0   : > { %v2566_v30 = vsub.f32 1.0, %v2565_v41  ;;  %v2613_v44 = vmul.f32 %v2562_v19, %v4680_v38  ;;  %v2588_v15 = vand.u32 2147483647, %v2487_v23 }
 0x2e2   : > { %v2567_v39 = vmul.f32 %v3393_v50, %v2566_v30  ;;  %vm2589_vm9 = vcmp.eq.f32.partialorder %v2588_v15, 8.507059e+37 }
 0x2e4   : > { %v3395_v14 = vpop.eup %3394  ;;  %v2568_v34 = vadd.f32 %v3393_v50, %v2567_v39 }
 0x2e5   : > { %v3397_v61 = vpop.eup %3396  ;;  %v2488_v47 = vadd.f32 1.0, %v3395_v14 }
 0x2e6   : > { %v2572_v58 = vsel %vm2571_vm15, %v3393_v50, %v2568_v34  ;;  %v2580_v43 = vmul.f32 %v3397_v61, %v2487_v23  ;;  %vm2585_vm1 = vweird.f32 %v3397_v61 }
 0x2e7   : > { %v2577_v8 = vsel %vm2574_vm0, %v2576_v55, %v2572_v58  ;;  %3398 = vrcp.f32 %v2488_v47  ;;  %vm2586_vm4 = vmor %vm2584_vm3, %vm2585_vm1  ;;  %v2605_v28 = vand.u32 2147483648, %v2488_v47  ;;  %v2603_v38 = vand.u32 2147483647, %v2488_v47 }
 0x2e8   : > { %v2614_v48 = vmul.f32 %v2577_v8, %v4698_v42  ;;  %v2581_v37 = vsub.f32 1.0, %v2580_v43  ;;  %v2591_v42 = vor.u32 1.1754944e-38, %v2590_v13  ;;  %vm2599_vm10 = vweird.f32 %v2488_v47 }
 0x2e9   : > { %v2606_v36 = vor.u32 1.1754944e-38, %v2605_v28  ;;  %vm2604_vm5 = vcmp.eq.f32.partialorder %v2603_v38, 8.507059e+37 }
 0x2ea   : > { %v2619_v7 = vpack.c.bf16 %v2614_v48, %v2613_v44  ;;  %v2582_v22 = vmul.f32 %v3397_v61, %v2581_v37 }
 0x2ec   : > { %3178 = vmatmul.msk.bf16.gmra.mxu2 %vm1708_vm7, %v2619_v7  ;;  %v2583_v49 = vadd.f32 %v3397_v61, %v2582_v22 }
 0x2ed   : > { %v3399_v4 = vpop.eup %3398 }
 0x2ee   : > { %v2595_v63 = vmul.f32 %v3399_v4, %v2488_v47  ;;  %v2587_v31 = vsel %vm2586_vm4, %v3397_v61, %v2583_v49  ;;  %vm2600_vm6 = vweird.f32 %v3399_v4 }
 0x2ef   : > { %v2592_v12 = vsel %vm2589_vm9, %v2591_v42, %v2587_v31  ;;  %vm2601_vm2 = vmor %vm2599_vm10, %vm2600_vm6 }
 0x2f0   : > { %v2596_v24 = vsub.f32 1.0, %v2595_v63  ;;  %v2615_v25 = vmul.f32 %v2592_v12, %v4721_v53 }
 0x2f2   : > { %v2597_v11 = vmul.f32 %v3399_v4, %v2596_v24 }
 0x2f4   : > { %v2598_v46 = vadd.f32 %v3399_v4, %v2597_v11 }
 0x2f6   : > { %v2602_v6 = vsel %vm2601_vm2, %v3399_v4, %v2598_v46 }
 0x2f7   : > { %v2607_v20 = vsel %vm2604_vm5, %v2606_v36, %v2602_v6 }
 0x2f8   : > { %v2616_v27 = vmul.f32 %v2607_v20, %v4729_v32 }
 0x2fa   : > { %v2620_v2 = vpack.c.bf16 %v2616_v27, %v2615_v25 }
 0x2fc   : > { %3179 = vmatmul.msk.bf16.gmra.mxu2 %vm1708_vm7, %v2620_v2 }
 0x34f   : > { %v2678_v45 = vpop.f32.mrf.mxu2 }
 0x350   : > { %v2679_v3 = vadd.f32 %v3335_v1, %v2678_v45 }
 0x352   : > { %2698 = vst [vmem:[%s348_s29] sm:$0xff] %v2679_v3 }
 0x357   : > { %v2680_v9 = vpop.f32.mrf.mxu2 }
 0x358   : > { %v2681_v10 = vadd.f32 %v3335_v1, %v2680_v9 }
 0x35a   : > { %2699 = vst [vmem:[%s348_s29 + $0x8] sm:$0xff] %v2681_v10 }
 0x35f   : > { %v2683_v17 = vpop.f32.mrf.mxu2 }
 0x360   : > { %v2684_v53 = vadd.f32 %v3335_v1, %v2683_v17 }
 0x362   : > { %2700 = vst [vmem:[%s348_s29 + $0x10] sm:$0xff] %v2684_v53 }
 0x367   : > { %v2685_v33 = vpop.f32.mrf.mxu2 }
 0x368   : > { %v2686_v59 = vadd.f32 %v3335_v1, %v2685_v33 }
 0x36a   : > { %2701 = vst [vmem:[%s348_s29 + $0x18] sm:$0xff] %v2686_v59 }
 0x36f   : > { %v2688_v35 = vpop.f32.mrf.mxu2 }
 0x370   : > { %v2689_v57 = vadd.f32 %v3335_v1, %v2688_v35 }
 0x372   : > { %2702 = vst [vmem:[%s348_s29 + $0x20] sm:$0xff] %v2689_v57 }
 0x377   : > { %v2690_v21 = vpop.f32.mrf.mxu2 }
 0x378   : > { %v2691_v60 = vadd.f32 %v3335_v1, %v2690_v21 }
 0x37a   : > { %2703 = vst [vmem:[%s348_s29 + $0x28] sm:$0xff] %v2691_v60 }
 0x37f   : > { %v2693_v29 = vpop.f32.mrf.mxu2 }
 0x380   : > { %v2694_v51 = vadd.f32 %v3335_v1, %v2693_v29 }
 0x382   : > { %2704 = vst [vmem:[%s348_s29 + $0x30] sm:$0xff] %v2694_v51 }
 0x387   : > { %v2695_v0 = vpop.f32.mrf.mxu2 }
 0x388   : > { %v2696_v32 = vadd.f32 %v3335_v1, %v2695_v0 }
 0x38a   : > { %2705 = vst [vmem:[%s348_s29 + $0x38] sm:$0xff] %v2696_v32 }
 0x38b   : > { %3547 = shalt.err (!%p3544_p10)
}
 0x38c   : > { %s3602_s15 = smov 128   ;;  %s3603_s29 = smov 8  }
 0x38d   : > { %3265 = dma.vmem_to_hbm [thread:$0]  (%p3735_p3), %s2720_s1, 1024, %s2722_s23, %s2707_s30, %s3602_s15, %s3602_s15, %s3603_s29  }
 0x38e PF: > { %s2736_s9 = sand.u32 1, %s3582_s24   ;;  %p4823_p12 = scmp.ge.s32.totalorder %s3594_s27, 2 }
 0x38f   : > { %s2737_s21 = scalar_lea.sflag [#allocation4], %s2736_s9 }
 0x390   : > { %p3282_p13 = pnand %p4823_p12, %p3679_p6 }
 0x392   : > { %p3283_p0 = pneg %p3282_p13 }
 0x394   : > { %3577 = dma.done.wait (%p3283_p0), %s2737_s21, 1024  }
 0x395   : > { %3579 = vsyncadd (%p3283_p0), %s2737_s21, 4294966272  ;;  %p22_p5 = scmp.ge.s32.totalorder %s3717_s13, 4   ;;  %s4824_s24 = smov %s3586_s25 }
 0x396   : > { %s4825_s25 = smov %s3590_s26  ;;  %s4826_s26 = smov %s3731_s17 }
 0x397   : > { %s4827_s27 = smov %s3717_s13  ;;  %24 = sbr.rel (!%p22_p5) target bundleno = 9 (0x9), region = 121 }
 0x39c   :  { %2743 = vsyncpa [#allocation3], 1 }
 0x39d   :  { %2745 = vsyncpa [#allocation3 + $0x1], 1 }
 0x39e   :  { %2746 = vsyncpa [#allocation6], 1 }
 0x39f   :  { %2747 = vsyncpa [#allocation9], 1 }
 0x3a0   :  { %2748 = vsyncpa [#allocation4], 1 }
 0x3a1   :  { %2750 = vsyncpa [#allocation4 + $0x1], 1 }

</bundles_post_ra>
